<compile_context>
chip_gen: v6e
topology: v6e:2x2x1
jax: 0.10.0
libtpu: 0.0.40
codegen_flags: <defaults>
</compile_context>

<pallas_src>
import functools

import jax
import jax.numpy as jnp
from jax import lax
from jax.experimental import pallas as pl
from jax.experimental.pallas import tpu as pltpu


def dsconv5x5_kernel(x_ref, p_ref, out_ref, *, N, Cin, Cout, H, W, dilation):
    # x_ref  : (N*Cin, H*W)   NCHW input, batch packed into sublanes
    # p_ref  : (rows_pad, H*W) coalesced parameter slab:
    #            rows [0, N*Cin)        : cols 0..24 depthwise weights (BN1 folded),
    #                                     col 25     folded BN1 shift
    #            rows [N*Cin, +Cout)    : cols 0..Cin-1 1x1 weights (BN2 folded),
    #                                     col Cin    folded BN2 shift
    #            row  N*Cin+Cout        : per-lane h coordinate (f32)
    #            row  N*Cin+Cout+1      : per-lane w coordinate (f32)
    # out_ref: (N*Cout, H*W)
    HW = H * W
    NC = N * Cin
    d = dilation

    x = x_ref[...]                                  # (N*Cin, HW) f32
    slab = p_ref[...]                               # (rows_pad, HW) f32

    dw = slab[0:NC, 0:25]                           # (N*Cin, 25)
    b1 = slab[0:NC, 25:26]                          # (N*Cin, 1)
    w0 = slab[NC:NC + Cout, 0:Cin]                  # (Cout, Cin)
    b2 = slab[NC:NC + Cout, Cin:Cin + 1]            # (Cout, 1)
    hrow = slab[NC + Cout:NC + Cout + 1, :]         # (1, HW)  h per lane
    wrow = slab[NC + Cout + 1:NC + Cout + 2, :]     # (1, HW)  w per lane

    # Distinct boundary masks built once (only offsets +/-d and +/-2d occur).
    # f32 comparisons against exact small integers.
    h_mask = {0: None}
    w_mask = {0: None}
    for s in (1, 2):
        k = s * d
        h_mask[k] = hrow < float(H - k)
        h_mask[-k] = hrow >= float(k)
        w_mask[k] = wrow < float(W - k)
        w_mask[-k] = wrow >= float(k)

    # ---- depthwise 5x5 (dilation d) + folded BN1 + ReLU ----
    # Each tap is a static lane rotation (XLU) of the unpadded block; lanes
    # whose source pixel falls outside the image are zeroed by the masks
    # (this also covers the wrap-around introduced by the rotation).
    acc1 = jnp.zeros((NC, HW), jnp.float32)
    for ki in range(5):
        for kj in range(5):
            di = d * (ki - 2)
            dj = d * (kj - 2)
            off = di * W + dj
            if off == 0:
                tap = x
            else:
                tap = pltpu.roll(x, shift=(-off) % HW, axis=1)
            masks = [m for m in (h_mask[di], w_mask[dj]) if m is not None]
            if masks:
                valid = masks[0] if len(masks) == 1 else (masks[0] & masks[1])
                tap = jnp.where(valid, tap, 0.0)
            t = ki * 5 + kj
            acc1 = acc1 + tap * dw[:, t:t + 1]      # per-sublane weight
    r1 = jnp.maximum(acc1 + b1, 0.0)                # (N*Cin, HW)

    # ---- 1x1 conv as Cin VPU broadcast-FMAs per batch + folded BN2 + ReLU ----
    # (For Cin/Cout >= ~64 this should move to the MXU via jnp.dot; at 4/8 the
    #  VPU outer products are the right unit.)
    outs = []
    for n in range(N):
        acc2 = jnp.zeros((Cout, HW), jnp.float32)
        for ci in range(Cin):
            row = r1[n * Cin + ci:n * Cin + ci + 1, :]      # (1, HW)
            acc2 = acc2 + w0[:, ci:ci + 1] * row            # outer product
        outs.append(jnp.maximum(acc2 + b2, 0.0))            # (Cout, HW)
    out = outs[0] if N == 1 else jnp.concatenate(outs, axis=0)  # (N*Cout, HW)

    out_ref[...] = out.astype(out_ref.dtype)        # lane-dense store


def dsconv5x5(x_nchw, dw, bn1_scale, bn1_shift, w0, bn2_scale, bn2_shift,
              *, dilation=1):
    """DSConv5x5 forward (stride=1, inference-mode BN).

    x_nchw: (N, Cin, H, W) f32
    dw:     (Cin, 5, 5)    depthwise weights  (torch (Cin,1,5,5) squeezed)
    w0:     (Cout, Cin)    pointwise weights  (torch (Cout,Cin,1,1) squeezed)
    bn*_scale / bn*_shift: folded inference-mode BatchNorm affine per channel.
    """
    N, Cin, H, W = x_nchw.shape
    Cout = w0.shape[0]
    HW = H * W
    NC = N * Cin
    NCo = N * Cout
    assert HW >= 26 and HW >= Cin + 1, "parameter slab layout needs wider lanes"

    # Batch packed into sublanes (free view of contiguous NCHW).
    xf = x_nchw.reshape(NC, HW).astype(jnp.float32)

    # Fold BN scales into the conv weights (inference-mode BatchNorm).
    dwf = (dw * bn1_scale[:, None, None]).reshape(Cin, 25).astype(jnp.float32)
    b1 = bn1_shift.reshape(Cin, 1).astype(jnp.float32)
    w0f = (w0 * bn2_scale[:, None]).astype(jnp.float32)
    b2 = bn2_shift.reshape(Cout, 1).astype(jnp.float32)

    # Coalesce all small parameters + per-lane (h, w) coordinate rows into a
    # single f32 slab -> one DMA instead of five.
    rows = NC + Cout + 2
    rows_pad = ((rows + 7) // 8) * 8
    h_idx = jnp.repeat(jnp.arange(H, dtype=jnp.float32), W)      # (HW,)
    w_idx = jnp.tile(jnp.arange(W, dtype=jnp.float32), H)        # (HW,)
    slab = jnp.zeros((rows_pad, HW), jnp.float32)
    slab = slab.at[0:NC, 0:25].set(jnp.tile(dwf, (N, 1)))
    slab = slab.at[0:NC, 25:26].set(jnp.tile(b1, (N, 1)))
    slab = slab.at[NC:NC + Cout, 0:Cin].set(w0f)
    slab = slab.at[NC:NC + Cout, Cin:Cin + 1].set(b2)
    slab = slab.at[NC + Cout, :].set(h_idx)
    slab = slab.at[NC + Cout + 1, :].set(w_idx)

    kernel = functools.partial(dsconv5x5_kernel, N=N, Cin=Cin, Cout=Cout,
                               H=H, W=W, dilation=dilation)
    out_flat = pl.pallas_call(
        kernel,
        out_shape=jax.ShapeDtypeStruct((NCo, HW), jnp.float32),
        grid=(1,),
        in_specs=[
            pl.BlockSpec((NC, HW), lambda i: (0, 0)),
            pl.BlockSpec((rows_pad, HW), lambda i: (0, 0)),
        ],
        out_specs=pl.BlockSpec((NCo, HW), lambda i: (0, 0)),
        compiler_params=pltpu.CompilerParams(
            dimension_semantics=("arbitrary",)),
    )(xf, slab)
    return out_flat.reshape(N, Cout, H, W)


def reference_nchw(x, dw, g1, be1, m1, v1, w0, g2, be2, m2, v2, eps, dilation=1):
    """Pure-JAX reference (lax conv) for validation, inference-mode BN."""
    N, Cin, H, W = x.shape
    Cout = w0.shape[0]
    dn = ("NCHW", "OIHW", "NCHW")
    pad = 2 * dilation
    y = lax.conv_general_dilated(
        x, dw.reshape(Cin, 1, 5, 5), (1, 1), ((pad, pad), (pad, pad)),
        rhs_dilation=(dilation, dilation), dimension_numbers=dn,
        feature_group_count=Cin)
    y = ((y - m1[None, :, None, None])
         * (g1 / jnp.sqrt(v1 + eps))[None, :, None, None]
         + be1[None, :, None, None])
    y = jnp.maximum(y, 0.0)
    z = lax.conv_general_dilated(
        y, w0.reshape(Cout, Cin, 1, 1), (1, 1), "VALID", dimension_numbers=dn)
    z = ((z - m2[None, :, None, None])
         * (g2 / jnp.sqrt(v2 + eps))[None, :, None, None]
         + be2[None, :, None, None])
    return jnp.maximum(z, 0.0)


if __name__ == "__main__":
    # Module config: in_channel=4, out_channel=8; input NCHW (2, 4, 16, 16).
    N, Cin, H, W = 2, 4, 16, 16
    Cout = 8
    eps = 1e-5
    dilation = 1

    key = jax.random.PRNGKey(0)
    keys = jax.random.split(key, 11)

    x = jax.random.normal(keys[0], (N, Cin, H, W), dtype=jnp.float32)

    # torch dw weight (Cin,1,5,5) -> (Cin,5,5); torch 1x1 weight (Cout,Cin,1,1) -> (Cout,Cin)
    dw = 0.2 * jax.random.normal(keys[1], (Cin, 5, 5), dtype=jnp.float32)
    w0 = 0.3 * jax.random.normal(keys[2], (Cout, Cin), dtype=jnp.float32)

    # BatchNorm (inference-mode) parameters for both stages.
    g1 = 1.0 + 0.1 * jax.random.normal(keys[3], (Cin,), dtype=jnp.float32)
    be1 = 0.1 * jax.random.normal(keys[4], (Cin,), dtype=jnp.float32)
    m1 = 0.1 * jax.random.normal(keys[5], (Cin,), dtype=jnp.float32)
    v1 = jnp.abs(1.0 + 0.1 * jax.random.normal(keys[6], (Cin,), dtype=jnp.float32))
    g2 = 1.0 + 0.1 * jax.random.normal(keys[7], (Cout,), dtype=jnp.float32)
    be2 = 0.1 * jax.random.normal(keys[8], (Cout,), dtype=jnp.float32)
    m2 = 0.1 * jax.random.normal(keys[9], (Cout,), dtype=jnp.float32)
    v2 = jnp.abs(1.0 + 0.1 * jax.random.normal(keys[10], (Cout,), dtype=jnp.float32))

    s1 = g1 / jnp.sqrt(v1 + eps)
    b1 = be1 - m1 * s1
    s2 = g2 / jnp.sqrt(v2 + eps)
    b2 = be2 - m2 * s2

    out = dsconv5x5(x, dw, s1, b1, w0, s2, b2, dilation=dilation)
    out = jax.block_until_ready(out)

    ref = reference_nchw(x, dw, g1, be1, m1, v1, w0, g2, be2, m2, v2, eps, dilation)
    assert out.shape == (N, Cout, H, W)
    assert jnp.allclose(out, ref, atol=2e-3, rtol=2e-3), "mismatch vs JAX reference"

    print("KERNEL_OK")
</pallas_src>

<mosaic_0001>
module attributes {stable_mosaic.version = 11 : i64} {
  func.func @dsconv5x5_kernel(%arg0: i32, %arg1: memref<8x256xf32, #tpu.memory_space<vmem>>, %arg2: memref<24x256xf32, #tpu.memory_space<vmem>>, %arg3: memref<16x256xf32, #tpu.memory_space<vmem>>) attributes {dimension_semantics = [#tpu.dimension_semantics<arbitrary>], iteration_bounds = array<i64: 1>, scalar_prefetch = 0 : i64, scratch_operands = 0 : i64, tpu.core_type = #tpu.core_type<tc>, window_params = [{pipeline_mode = #tpu.pipeline_mode<synchronous>, transform_indices = @transform_0, window_bounds = array<i64: 8, 256>}, {pipeline_mode = #tpu.pipeline_mode<synchronous>, transform_indices = @transform_1, window_bounds = array<i64: 24, 256>}, {pipeline_mode = #tpu.pipeline_mode<synchronous>, transform_indices = @transform_2, window_bounds = array<i64: 16, 256>}]} {
    %c0 = arith.constant 0 : index
    %c0_0 = arith.constant 0 : index
    %0 = vector.load %arg1[%c0, %c0_0] : memref<8x256xf32, #tpu.memory_space<vmem>>, vector<8x256xf32>
    %c0_1 = arith.constant 0 : index
    %c0_2 = arith.constant 0 : index
    %1 = vector.load %arg2[%c0_1, %c0_2] : memref<24x256xf32, #tpu.memory_space<vmem>>, vector<24x256xf32>
    %2 = vector.extract_strided_slice %1 {offsets = [0, 0], sizes = [8, 25], strides = [1, 1]} : vector<24x256xf32> to vector<8x25xf32>
    %3 = vector.extract_strided_slice %1 {offsets = [0, 25], sizes = [8, 1], strides = [1, 1]} : vector<24x256xf32> to vector<8x1xf32>
    %4 = vector.extract_strided_slice %1 {offsets = [8, 0], sizes = [8, 4], strides = [1, 1]} : vector<24x256xf32> to vector<8x4xf32>
    %5 = vector.extract_strided_slice %1 {offsets = [8, 4], sizes = [8, 1], strides = [1, 1]} : vector<24x256xf32> to vector<8x1xf32>
    %6 = vector.extract_strided_slice %1 {offsets = [16, 0], sizes = [1, 256], strides = [1, 1]} : vector<24x256xf32> to vector<1x256xf32>
    %7 = vector.extract_strided_slice %1 {offsets = [17, 0], sizes = [1, 256], strides = [1, 1]} : vector<24x256xf32> to vector<1x256xf32>
    %cst = arith.constant 1.500000e+01 : f32
    %8 = vector.broadcast %cst : f32 to vector<1x256xf32>
    %9 = arith.cmpf olt, %6, %8 : vector<1x256xf32>
    %cst_3 = arith.constant 1.000000e+00 : f32
    %10 = vector.broadcast %cst_3 : f32 to vector<1x256xf32>
    %11 = arith.cmpf oge, %6, %10 : vector<1x256xf32>
    %cst_4 = arith.constant 1.500000e+01 : f32
    %12 = vector.broadcast %cst_4 : f32 to vector<1x256xf32>
    %13 = arith.cmpf olt, %7, %12 : vector<1x256xf32>
    %cst_5 = arith.constant 1.000000e+00 : f32
    %14 = vector.broadcast %cst_5 : f32 to vector<1x256xf32>
    %15 = arith.cmpf oge, %7, %14 : vector<1x256xf32>
    %cst_6 = arith.constant 1.400000e+01 : f32
    %16 = vector.broadcast %cst_6 : f32 to vector<1x256xf32>
    %17 = arith.cmpf olt, %6, %16 : vector<1x256xf32>
    %cst_7 = arith.constant 2.000000e+00 : f32
    %18 = vector.broadcast %cst_7 : f32 to vector<1x256xf32>
    %19 = arith.cmpf oge, %6, %18 : vector<1x256xf32>
    %cst_8 = arith.constant 1.400000e+01 : f32
    %20 = vector.broadcast %cst_8 : f32 to vector<1x256xf32>
    %21 = arith.cmpf olt, %7, %20 : vector<1x256xf32>
    %cst_9 = arith.constant 2.000000e+00 : f32
    %22 = vector.broadcast %cst_9 : f32 to vector<1x256xf32>
    %23 = arith.cmpf oge, %7, %22 : vector<1x256xf32>
    %cst_10 = arith.constant 0.000000e+00 : f32
    %24 = vector.broadcast %cst_10 : f32 to vector<8x256xf32>
    %c34_i32 = arith.constant 34 : i32
    %25 = tpu.dynamic_rotate %0 by %c34_i32 dim 1 : vector<8x256xf32>, i32 -> vector<8x256xf32>
    %26 = arith.andi %19, %23 : vector<1x256xi1>
    %cst_11 = arith.constant 0.000000e+00 : f32
    %27 = vector.shape_cast %26 : vector<1x256xi1> to vector<1x256xi1>
    %28 = vector.broadcast %27 : vector<1x256xi1> to vector<8x256xi1>
    %29 = vector.broadcast %cst_11 : f32 to vector<8x256xf32>
    %30 = arith.select %28, %25, %29 : vector<8x256xi1>, vector<8x256xf32>
    %31 = vector.extract_strided_slice %2 {offsets = [0, 0], sizes = [8, 1], strides = [1, 1]} : vector<8x25xf32> to vector<8x1xf32>
    %32 = vector.broadcast %31 : vector<8x1xf32> to vector<8x256xf32>
    %33 = arith.mulf %30, %32 : vector<8x256xf32>
    %34 = arith.addf %24, %33 : vector<8x256xf32>
    %c33_i32 = arith.constant 33 : i32
    %35 = tpu.dynamic_rotate %0 by %c33_i32 dim 1 : vector<8x256xf32>, i32 -> vector<8x256xf32>
    %36 = arith.andi %19, %15 : vector<1x256xi1>
    %cst_12 = arith.constant 0.000000e+00 : f32
    %37 = vector.shape_cast %36 : vector<1x256xi1> to vector<1x256xi1>
    %38 = vector.broadcast %37 : vector<1x256xi1> to vector<8x256xi1>
    %39 = vector.broadcast %cst_12 : f32 to vector<8x256xf32>
    %40 = arith.select %38, %35, %39 : vector<8x256xi1>, vector<8x256xf32>
    %41 = vector.extract_strided_slice %2 {offsets = [0, 1], sizes = [8, 1], strides = [1, 1]} : vector<8x25xf32> to vector<8x1xf32>
    %42 = vector.broadcast %41 : vector<8x1xf32> to vector<8x256xf32>
    %43 = arith.mulf %40, %42 : vector<8x256xf32>
    %44 = arith.addf %34, %43 : vector<8x256xf32>
    %c32_i32 = arith.constant 32 : i32
    %45 = tpu.dynamic_rotate %0 by %c32_i32 dim 1 : vector<8x256xf32>, i32 -> vector<8x256xf32>
    %cst_13 = arith.constant 0.000000e+00 : f32
    %46 = vector.shape_cast %19 : vector<1x256xi1> to vector<1x256xi1>
    %47 = vector.broadcast %46 : vector<1x256xi1> to vector<8x256xi1>
    %48 = vector.broadcast %cst_13 : f32 to vector<8x256xf32>
    %49 = arith.select %47, %45, %48 : vector<8x256xi1>, vector<8x256xf32>
    %50 = vector.extract_strided_slice %2 {offsets = [0, 2], sizes = [8, 1], strides = [1, 1]} : vector<8x25xf32> to vector<8x1xf32>
    %51 = vector.broadcast %50 : vector<8x1xf32> to vector<8x256xf32>
    %52 = arith.mulf %49, %51 : vector<8x256xf32>
    %53 = arith.addf %44, %52 : vector<8x256xf32>
    %c31_i32 = arith.constant 31 : i32
    %54 = tpu.dynamic_rotate %0 by %c31_i32 dim 1 : vector<8x256xf32>, i32 -> vector<8x256xf32>
    %55 = arith.andi %19, %13 : vector<1x256xi1>
    %cst_14 = arith.constant 0.000000e+00 : f32
    %56 = vector.shape_cast %55 : vector<1x256xi1> to vector<1x256xi1>
    %57 = vector.broadcast %56 : vector<1x256xi1> to vector<8x256xi1>
    %58 = vector.broadcast %cst_14 : f32 to vector<8x256xf32>
    %59 = arith.select %57, %54, %58 : vector<8x256xi1>, vector<8x256xf32>
    %60 = vector.extract_strided_slice %2 {offsets = [0, 3], sizes = [8, 1], strides = [1, 1]} : vector<8x25xf32> to vector<8x1xf32>
    %61 = vector.broadcast %60 : vector<8x1xf32> to vector<8x256xf32>
    %62 = arith.mulf %59, %61 : vector<8x256xf32>
    %63 = arith.addf %53, %62 : vector<8x256xf32>
    %c30_i32 = arith.constant 30 : i32
    %64 = tpu.dynamic_rotate %0 by %c30_i32 dim 1 : vector<8x256xf32>, i32 -> vector<8x256xf32>
    %65 = arith.andi %19, %21 : vector<1x256xi1>
    %cst_15 = arith.constant 0.000000e+00 : f32
    %66 = vector.shape_cast %65 : vector<1x256xi1> to vector<1x256xi1>
    %67 = vector.broadcast %66 : vector<1x256xi1> to vector<8x256xi1>
    %68 = vector.broadcast %cst_15 : f32 to vector<8x256xf32>
    %69 = arith.select %67, %64, %68 : vector<8x256xi1>, vector<8x256xf32>
    %70 = vector.extract_strided_slice %2 {offsets = [0, 4], sizes = [8, 1], strides = [1, 1]} : vector<8x25xf32> to vector<8x1xf32>
    %71 = vector.broadcast %70 : vector<8x1xf32> to vector<8x256xf32>
    %72 = arith.mulf %69, %71 : vector<8x256xf32>
    %73 = arith.addf %63, %72 : vector<8x256xf32>
    %c18_i32 = arith.constant 18 : i32
    %74 = tpu.dynamic_rotate %0 by %c18_i32 dim 1 : vector<8x256xf32>, i32 -> vector<8x256xf32>
    %75 = arith.andi %11, %23 : vector<1x256xi1>
    %cst_16 = arith.constant 0.000000e+00 : f32
    %76 = vector.shape_cast %75 : vector<1x256xi1> to vector<1x256xi1>
    %77 = vector.broadcast %76 : vector<1x256xi1> to vector<8x256xi1>
    %78 = vector.broadcast %cst_16 : f32 to vector<8x256xf32>
    %79 = arith.select %77, %74, %78 : vector<8x256xi1>, vector<8x256xf32>
    %80 = vector.extract_strided_slice %2 {offsets = [0, 5], sizes = [8, 1], strides = [1, 1]} : vector<8x25xf32> to vector<8x1xf32>
    %81 = vector.broadcast %80 : vector<8x1xf32> to vector<8x256xf32>
    %82 = arith.mulf %79, %81 : vector<8x256xf32>
    %83 = arith.addf %73, %82 : vector<8x256xf32>
    %c17_i32 = arith.constant 17 : i32
    %84 = tpu.dynamic_rotate %0 by %c17_i32 dim 1 : vector<8x256xf32>, i32 -> vector<8x256xf32>
    %85 = arith.andi %11, %15 : vector<1x256xi1>
    %cst_17 = arith.constant 0.000000e+00 : f32
    %86 = vector.shape_cast %85 : vector<1x256xi1> to vector<1x256xi1>
    %87 = vector.broadcast %86 : vector<1x256xi1> to vector<8x256xi1>
    %88 = vector.broadcast %cst_17 : f32 to vector<8x256xf32>
    %89 = arith.select %87, %84, %88 : vector<8x256xi1>, vector<8x256xf32>
    %90 = vector.extract_strided_slice %2 {offsets = [0, 6], sizes = [8, 1], strides = [1, 1]} : vector<8x25xf32> to vector<8x1xf32>
    %91 = vector.broadcast %90 : vector<8x1xf32> to vector<8x256xf32>
    %92 = arith.mulf %89, %91 : vector<8x256xf32>
    %93 = arith.addf %83, %92 : vector<8x256xf32>
    %c16_i32 = arith.constant 16 : i32
    %94 = tpu.dynamic_rotate %0 by %c16_i32 dim 1 : vector<8x256xf32>, i32 -> vector<8x256xf32>
    %cst_18 = arith.constant 0.000000e+00 : f32
    %95 = vector.shape_cast %11 : vector<1x256xi1> to vector<1x256xi1>
    %96 = vector.broadcast %95 : vector<1x256xi1> to vector<8x256xi1>
    %97 = vector.broadcast %cst_18 : f32 to vector<8x256xf32>
    %98 = arith.select %96, %94, %97 : vector<8x256xi1>, vector<8x256xf32>
    %99 = vector.extract_strided_slice %2 {offsets = [0, 7], sizes = [8, 1], strides = [1, 1]} : vector<8x25xf32> to vector<8x1xf32>
    %100 = vector.broadcast %99 : vector<8x1xf32> to vector<8x256xf32>
    %101 = arith.mulf %98, %100 : vector<8x256xf32>
    %102 = arith.addf %93, %101 : vector<8x256xf32>
    %c15_i32 = arith.constant 15 : i32
    %103 = tpu.dynamic_rotate %0 by %c15_i32 dim 1 : vector<8x256xf32>, i32 -> vector<8x256xf32>
    %104 = arith.andi %11, %13 : vector<1x256xi1>
    %cst_19 = arith.constant 0.000000e+00 : f32
    %105 = vector.shape_cast %104 : vector<1x256xi1> to vector<1x256xi1>
    %106 = vector.broadcast %105 : vector<1x256xi1> to vector<8x256xi1>
    %107 = vector.broadcast %cst_19 : f32 to vector<8x256xf32>
    %108 = arith.select %106, %103, %107 : vector<8x256xi1>, vector<8x256xf32>
    %109 = vector.extract_strided_slice %2 {offsets = [0, 8], sizes = [8, 1], strides = [1, 1]} : vector<8x25xf32> to vector<8x1xf32>
    %110 = vector.broadcast %109 : vector<8x1xf32> to vector<8x256xf32>
    %111 = arith.mulf %108, %110 : vector<8x256xf32>
    %112 = arith.addf %102, %111 : vector<8x256xf32>
    %c14_i32 = arith.constant 14 : i32
    %113 = tpu.dynamic_rotate %0 by %c14_i32 dim 1 : vector<8x256xf32>, i32 -> vector<8x256xf32>
    %114 = arith.andi %11, %21 : vector<1x256xi1>
    %cst_20 = arith.constant 0.000000e+00 : f32
    %115 = vector.shape_cast %114 : vector<1x256xi1> to vector<1x256xi1>
    %116 = vector.broadcast %115 : vector<1x256xi1> to vector<8x256xi1>
    %117 = vector.broadcast %cst_20 : f32 to vector<8x256xf32>
    %118 = arith.select %116, %113, %117 : vector<8x256xi1>, vector<8x256xf32>
    %119 = vector.extract_strided_slice %2 {offsets = [0, 9], sizes = [8, 1], strides = [1, 1]} : vector<8x25xf32> to vector<8x1xf32>
    %120 = vector.broadcast %119 : vector<8x1xf32> to vector<8x256xf32>
    %121 = arith.mulf %118, %120 : vector<8x256xf32>
    %122 = arith.addf %112, %121 : vector<8x256xf32>
    %c2_i32 = arith.constant 2 : i32
    %123 = tpu.dynamic_rotate %0 by %c2_i32 dim 1 : vector<8x256xf32>, i32 -> vector<8x256xf32>
    %cst_21 = arith.constant 0.000000e+00 : f32
    %124 = vector.shape_cast %23 : vector<1x256xi1> to vector<1x256xi1>
    %125 = vector.broadcast %124 : vector<1x256xi1> to vector<8x256xi1>
    %126 = vector.broadcast %cst_21 : f32 to vector<8x256xf32>
    %127 = arith.select %125, %123, %126 : vector<8x256xi1>, vector<8x256xf32>
    %128 = vector.extract_strided_slice %2 {offsets = [0, 10], sizes = [8, 1], strides = [1, 1]} : vector<8x25xf32> to vector<8x1xf32>
    %129 = vector.broadcast %128 : vector<8x1xf32> to vector<8x256xf32>
    %130 = arith.mulf %127, %129 : vector<8x256xf32>
    %131 = arith.addf %122, %130 : vector<8x256xf32>
    %c1_i32 = arith.constant 1 : i32
    %132 = tpu.dynamic_rotate %0 by %c1_i32 dim 1 : vector<8x256xf32>, i32 -> vector<8x256xf32>
    %cst_22 = arith.constant 0.000000e+00 : f32
    %133 = vector.shape_cast %15 : vector<1x256xi1> to vector<1x256xi1>
    %134 = vector.broadcast %133 : vector<1x256xi1> to vector<8x256xi1>
    %135 = vector.broadcast %cst_22 : f32 to vector<8x256xf32>
    %136 = arith.select %134, %132, %135 : vector<8x256xi1>, vector<8x256xf32>
    %137 = vector.extract_strided_slice %2 {offsets = [0, 11], sizes = [8, 1], strides = [1, 1]} : vector<8x25xf32> to vector<8x1xf32>
    %138 = vector.broadcast %137 : vector<8x1xf32> to vector<8x256xf32>
    %139 = arith.mulf %136, %138 : vector<8x256xf32>
    %140 = arith.addf %131, %139 : vector<8x256xf32>
    %141 = vector.extract_strided_slice %2 {offsets = [0, 12], sizes = [8, 1], strides = [1, 1]} : vector<8x25xf32> to vector<8x1xf32>
    %142 = vector.broadcast %141 : vector<8x1xf32> to vector<8x256xf32>
    %143 = arith.mulf %0, %142 : vector<8x256xf32>
    %144 = arith.addf %140, %143 : vector<8x256xf32>
    %c255_i32 = arith.constant 255 : i32
    %145 = tpu.dynamic_rotate %0 by %c255_i32 dim 1 : vector<8x256xf32>, i32 -> vector<8x256xf32>
    %cst_23 = arith.constant 0.000000e+00 : f32
    %146 = vector.shape_cast %13 : vector<1x256xi1> to vector<1x256xi1>
    %147 = vector.broadcast %146 : vector<1x256xi1> to vector<8x256xi1>
    %148 = vector.broadcast %cst_23 : f32 to vector<8x256xf32>
    %149 = arith.select %147, %145, %148 : vector<8x256xi1>, vector<8x256xf32>
    %150 = vector.extract_strided_slice %2 {offsets = [0, 13], sizes = [8, 1], strides = [1, 1]} : vector<8x25xf32> to vector<8x1xf32>
    %151 = vector.broadcast %150 : vector<8x1xf32> to vector<8x256xf32>
    %152 = arith.mulf %149, %151 : vector<8x256xf32>
    %153 = arith.addf %144, %152 : vector<8x256xf32>
    %c254_i32 = arith.constant 254 : i32
    %154 = tpu.dynamic_rotate %0 by %c254_i32 dim 1 : vector<8x256xf32>, i32 -> vector<8x256xf32>
    %cst_24 = arith.constant 0.000000e+00 : f32
    %155 = vector.shape_cast %21 : vector<1x256xi1> to vector<1x256xi1>
    %156 = vector.broadcast %155 : vector<1x256xi1> to vector<8x256xi1>
    %157 = vector.broadcast %cst_24 : f32 to vector<8x256xf32>
    %158 = arith.select %156, %154, %157 : vector<8x256xi1>, vector<8x256xf32>
    %159 = vector.extract_strided_slice %2 {offsets = [0, 14], sizes = [8, 1], strides = [1, 1]} : vector<8x25xf32> to vector<8x1xf32>
    %160 = vector.broadcast %159 : vector<8x1xf32> to vector<8x256xf32>
    %161 = arith.mulf %158, %160 : vector<8x256xf32>
    %162 = arith.addf %153, %161 : vector<8x256xf32>
    %c242_i32 = arith.constant 242 : i32
    %163 = tpu.dynamic_rotate %0 by %c242_i32 dim 1 : vector<8x256xf32>, i32 -> vector<8x256xf32>
    %164 = arith.andi %9, %23 : vector<1x256xi1>
    %cst_25 = arith.constant 0.000000e+00 : f32
    %165 = vector.shape_cast %164 : vector<1x256xi1> to vector<1x256xi1>
    %166 = vector.broadcast %165 : vector<1x256xi1> to vector<8x256xi1>
    %167 = vector.broadcast %cst_25 : f32 to vector<8x256xf32>
    %168 = arith.select %166, %163, %167 : vector<8x256xi1>, vector<8x256xf32>
    %169 = vector.extract_strided_slice %2 {offsets = [0, 15], sizes = [8, 1], strides = [1, 1]} : vector<8x25xf32> to vector<8x1xf32>
    %170 = vector.broadcast %169 : vector<8x1xf32> to vector<8x256xf32>
    %171 = arith.mulf %168, %170 : vector<8x256xf32>
    %172 = arith.addf %162, %171 : vector<8x256xf32>
    %c241_i32 = arith.constant 241 : i32
    %173 = tpu.dynamic_rotate %0 by %c241_i32 dim 1 : vector<8x256xf32>, i32 -> vector<8x256xf32>
    %174 = arith.andi %9, %15 : vector<1x256xi1>
    %cst_26 = arith.constant 0.000000e+00 : f32
    %175 = vector.shape_cast %174 : vector<1x256xi1> to vector<1x256xi1>
    %176 = vector.broadcast %175 : vector<1x256xi1> to vector<8x256xi1>
    %177 = vector.broadcast %cst_26 : f32 to vector<8x256xf32>
    %178 = arith.select %176, %173, %177 : vector<8x256xi1>, vector<8x256xf32>
    %179 = vector.extract_strided_slice %2 {offsets = [0, 16], sizes = [8, 1], strides = [1, 1]} : vector<8x25xf32> to vector<8x1xf32>
    %180 = vector.broadcast %179 : vector<8x1xf32> to vector<8x256xf32>
    %181 = arith.mulf %178, %180 : vector<8x256xf32>
    %182 = arith.addf %172, %181 : vector<8x256xf32>
    %c240_i32 = arith.constant 240 : i32
    %183 = tpu.dynamic_rotate %0 by %c240_i32 dim 1 : vector<8x256xf32>, i32 -> vector<8x256xf32>
    %cst_27 = arith.constant 0.000000e+00 : f32
    %184 = vector.shape_cast %9 : vector<1x256xi1> to vector<1x256xi1>
    %185 = vector.broadcast %184 : vector<1x256xi1> to vector<8x256xi1>
    %186 = vector.broadcast %cst_27 : f32 to vector<8x256xf32>
    %187 = arith.select %185, %183, %186 : vector<8x256xi1>, vector<8x256xf32>
    %188 = vector.extract_strided_slice %2 {offsets = [0, 17], sizes = [8, 1], strides = [1, 1]} : vector<8x25xf32> to vector<8x1xf32>
    %189 = vector.broadcast %188 : vector<8x1xf32> to vector<8x256xf32>
    %190 = arith.mulf %187, %189 : vector<8x256xf32>
    %191 = arith.addf %182, %190 : vector<8x256xf32>
    %c239_i32 = arith.constant 239 : i32
    %192 = tpu.dynamic_rotate %0 by %c239_i32 dim 1 : vector<8x256xf32>, i32 -> vector<8x256xf32>
    %193 = arith.andi %9, %13 : vector<1x256xi1>
    %cst_28 = arith.constant 0.000000e+00 : f32
    %194 = vector.shape_cast %193 : vector<1x256xi1> to vector<1x256xi1>
    %195 = vector.broadcast %194 : vector<1x256xi1> to vector<8x256xi1>
    %196 = vector.broadcast %cst_28 : f32 to vector<8x256xf32>
    %197 = arith.select %195, %192, %196 : vector<8x256xi1>, vector<8x256xf32>
    %198 = vector.extract_strided_slice %2 {offsets = [0, 18], sizes = [8, 1], strides = [1, 1]} : vector<8x25xf32> to vector<8x1xf32>
    %199 = vector.broadcast %198 : vector<8x1xf32> to vector<8x256xf32>
    %200 = arith.mulf %197, %199 : vector<8x256xf32>
    %201 = arith.addf %191, %200 : vector<8x256xf32>
    %c238_i32 = arith.constant 238 : i32
    %202 = tpu.dynamic_rotate %0 by %c238_i32 dim 1 : vector<8x256xf32>, i32 -> vector<8x256xf32>
    %203 = arith.andi %9, %21 : vector<1x256xi1>
    %cst_29 = arith.constant 0.000000e+00 : f32
    %204 = vector.shape_cast %203 : vector<1x256xi1> to vector<1x256xi1>
    %205 = vector.broadcast %204 : vector<1x256xi1> to vector<8x256xi1>
    %206 = vector.broadcast %cst_29 : f32 to vector<8x256xf32>
    %207 = arith.select %205, %202, %206 : vector<8x256xi1>, vector<8x256xf32>
    %208 = vector.extract_strided_slice %2 {offsets = [0, 19], sizes = [8, 1], strides = [1, 1]} : vector<8x25xf32> to vector<8x1xf32>
    %209 = vector.broadcast %208 : vector<8x1xf32> to vector<8x256xf32>
    %210 = arith.mulf %207, %209 : vector<8x256xf32>
    %211 = arith.addf %201, %210 : vector<8x256xf32>
    %c226_i32 = arith.constant 226 : i32
    %212 = tpu.dynamic_rotate %0 by %c226_i32 dim 1 : vector<8x256xf32>, i32 -> vector<8x256xf32>
    %213 = arith.andi %17, %23 : vector<1x256xi1>
    %cst_30 = arith.constant 0.000000e+00 : f32
    %214 = vector.shape_cast %213 : vector<1x256xi1> to vector<1x256xi1>
    %215 = vector.broadcast %214 : vector<1x256xi1> to vector<8x256xi1>
    %216 = vector.broadcast %cst_30 : f32 to vector<8x256xf32>
    %217 = arith.select %215, %212, %216 : vector<8x256xi1>, vector<8x256xf32>
    %218 = vector.extract_strided_slice %2 {offsets = [0, 20], sizes = [8, 1], strides = [1, 1]} : vector<8x25xf32> to vector<8x1xf32>
    %219 = vector.broadcast %218 : vector<8x1xf32> to vector<8x256xf32>
    %220 = arith.mulf %217, %219 : vector<8x256xf32>
    %221 = arith.addf %211, %220 : vector<8x256xf32>
    %c225_i32 = arith.constant 225 : i32
    %222 = tpu.dynamic_rotate %0 by %c225_i32 dim 1 : vector<8x256xf32>, i32 -> vector<8x256xf32>
    %223 = arith.andi %17, %15 : vector<1x256xi1>
    %cst_31 = arith.constant 0.000000e+00 : f32
    %224 = vector.shape_cast %223 : vector<1x256xi1> to vector<1x256xi1>
    %225 = vector.broadcast %224 : vector<1x256xi1> to vector<8x256xi1>
    %226 = vector.broadcast %cst_31 : f32 to vector<8x256xf32>
    %227 = arith.select %225, %222, %226 : vector<8x256xi1>, vector<8x256xf32>
    %228 = vector.extract_strided_slice %2 {offsets = [0, 21], sizes = [8, 1], strides = [1, 1]} : vector<8x25xf32> to vector<8x1xf32>
    %229 = vector.broadcast %228 : vector<8x1xf32> to vector<8x256xf32>
    %230 = arith.mulf %227, %229 : vector<8x256xf32>
    %231 = arith.addf %221, %230 : vector<8x256xf32>
    %c224_i32 = arith.constant 224 : i32
    %232 = tpu.dynamic_rotate %0 by %c224_i32 dim 1 : vector<8x256xf32>, i32 -> vector<8x256xf32>
    %cst_32 = arith.constant 0.000000e+00 : f32
    %233 = vector.shape_cast %17 : vector<1x256xi1> to vector<1x256xi1>
    %234 = vector.broadcast %233 : vector<1x256xi1> to vector<8x256xi1>
    %235 = vector.broadcast %cst_32 : f32 to vector<8x256xf32>
    %236 = arith.select %234, %232, %235 : vector<8x256xi1>, vector<8x256xf32>
    %237 = vector.extract_strided_slice %2 {offsets = [0, 22], sizes = [8, 1], strides = [1, 1]} : vector<8x25xf32> to vector<8x1xf32>
    %238 = vector.broadcast %237 : vector<8x1xf32> to vector<8x256xf32>
    %239 = arith.mulf %236, %238 : vector<8x256xf32>
    %240 = arith.addf %231, %239 : vector<8x256xf32>
    %c223_i32 = arith.constant 223 : i32
    %241 = tpu.dynamic_rotate %0 by %c223_i32 dim 1 : vector<8x256xf32>, i32 -> vector<8x256xf32>
    %242 = arith.andi %17, %13 : vector<1x256xi1>
    %cst_33 = arith.constant 0.000000e+00 : f32
    %243 = vector.shape_cast %242 : vector<1x256xi1> to vector<1x256xi1>
    %244 = vector.broadcast %243 : vector<1x256xi1> to vector<8x256xi1>
    %245 = vector.broadcast %cst_33 : f32 to vector<8x256xf32>
    %246 = arith.select %244, %241, %245 : vector<8x256xi1>, vector<8x256xf32>
    %247 = vector.extract_strided_slice %2 {offsets = [0, 23], sizes = [8, 1], strides = [1, 1]} : vector<8x25xf32> to vector<8x1xf32>
    %248 = vector.broadcast %247 : vector<8x1xf32> to vector<8x256xf32>
    %249 = arith.mulf %246, %248 : vector<8x256xf32>
    %250 = arith.addf %240, %249 : vector<8x256xf32>
    %c222_i32 = arith.constant 222 : i32
    %251 = tpu.dynamic_rotate %0 by %c222_i32 dim 1 : vector<8x256xf32>, i32 -> vector<8x256xf32>
    %252 = arith.andi %17, %21 : vector<1x256xi1>
    %cst_34 = arith.constant 0.000000e+00 : f32
    %253 = vector.shape_cast %252 : vector<1x256xi1> to vector<1x256xi1>
    %254 = vector.broadcast %253 : vector<1x256xi1> to vector<8x256xi1>
    %255 = vector.broadcast %cst_34 : f32 to vector<8x256xf32>
    %256 = arith.select %254, %251, %255 : vector<8x256xi1>, vector<8x256xf32>
    %257 = vector.extract_strided_slice %2 {offsets = [0, 24], sizes = [8, 1], strides = [1, 1]} : vector<8x25xf32> to vector<8x1xf32>
    %258 = vector.broadcast %257 : vector<8x1xf32> to vector<8x256xf32>
    %259 = arith.mulf %256, %258 : vector<8x256xf32>
    %260 = arith.addf %250, %259 : vector<8x256xf32>
    %261 = vector.broadcast %3 : vector<8x1xf32> to vector<8x256xf32>
    %262 = arith.addf %260, %261 : vector<8x256xf32>
    %cst_35 = arith.constant 0.000000e+00 : f32
    %263 = vector.broadcast %cst_35 : f32 to vector<8x256xf32>
    %264 = arith.maximumf %262, %263 : vector<8x256xf32>
    %cst_36 = arith.constant 0.000000e+00 : f32
    %265 = vector.broadcast %cst_36 : f32 to vector<8x256xf32>
    %266 = vector.extract_strided_slice %264 {offsets = [0, 0], sizes = [1, 256], strides = [1, 1]} : vector<8x256xf32> to vector<1x256xf32>
    %267 = vector.extract_strided_slice %4 {offsets = [0, 0], sizes = [8, 1], strides = [1, 1]} : vector<8x4xf32> to vector<8x1xf32>
    %268 = vector.broadcast %267 : vector<8x1xf32> to vector<8x256xf32>
    %269 = vector.broadcast %266 : vector<1x256xf32> to vector<8x256xf32>
    %270 = arith.mulf %268, %269 : vector<8x256xf32>
    %271 = arith.addf %265, %270 : vector<8x256xf32>
    %272 = vector.extract_strided_slice %264 {offsets = [1, 0], sizes = [1, 256], strides = [1, 1]} : vector<8x256xf32> to vector<1x256xf32>
    %273 = vector.extract_strided_slice %4 {offsets = [0, 1], sizes = [8, 1], strides = [1, 1]} : vector<8x4xf32> to vector<8x1xf32>
    %274 = vector.broadcast %273 : vector<8x1xf32> to vector<8x256xf32>
    %275 = vector.broadcast %272 : vector<1x256xf32> to vector<8x256xf32>
    %276 = arith.mulf %274, %275 : vector<8x256xf32>
    %277 = arith.addf %271, %276 : vector<8x256xf32>
    %278 = vector.extract_strided_slice %264 {offsets = [2, 0], sizes = [1, 256], strides = [1, 1]} : vector<8x256xf32> to vector<1x256xf32>
    %279 = vector.extract_strided_slice %4 {offsets = [0, 2], sizes = [8, 1], strides = [1, 1]} : vector<8x4xf32> to vector<8x1xf32>
    %280 = vector.broadcast %279 : vector<8x1xf32> to vector<8x256xf32>
    %281 = vector.broadcast %278 : vector<1x256xf32> to vector<8x256xf32>
    %282 = arith.mulf %280, %281 : vector<8x256xf32>
    %283 = arith.addf %277, %282 : vector<8x256xf32>
    %284 = vector.extract_strided_slice %264 {offsets = [3, 0], sizes = [1, 256], strides = [1, 1]} : vector<8x256xf32> to vector<1x256xf32>
    %285 = vector.extract_strided_slice %4 {offsets = [0, 3], sizes = [8, 1], strides = [1, 1]} : vector<8x4xf32> to vector<8x1xf32>
    %286 = vector.broadcast %285 : vector<8x1xf32> to vector<8x256xf32>
    %287 = vector.broadcast %284 : vector<1x256xf32> to vector<8x256xf32>
    %288 = arith.mulf %286, %287 : vector<8x256xf32>
    %289 = arith.addf %283, %288 : vector<8x256xf32>
    %290 = vector.broadcast %5 : vector<8x1xf32> to vector<8x256xf32>
    %291 = arith.addf %289, %290 : vector<8x256xf32>
    %cst_37 = arith.constant 0.000000e+00 : f32
    %292 = vector.broadcast %cst_37 : f32 to vector<8x256xf32>
    %293 = arith.maximumf %291, %292 : vector<8x256xf32>
    %cst_38 = arith.constant 0.000000e+00 : f32
    %294 = vector.broadcast %cst_38 : f32 to vector<8x256xf32>
    %295 = vector.extract_strided_slice %264 {offsets = [4, 0], sizes = [1, 256], strides = [1, 1]} : vector<8x256xf32> to vector<1x256xf32>
    %296 = vector.extract_strided_slice %4 {offsets = [0, 0], sizes = [8, 1], strides = [1, 1]} : vector<8x4xf32> to vector<8x1xf32>
    %297 = vector.broadcast %296 : vector<8x1xf32> to vector<8x256xf32>
    %298 = vector.broadcast %295 : vector<1x256xf32> to vector<8x256xf32>
    %299 = arith.mulf %297, %298 : vector<8x256xf32>
    %300 = arith.addf %294, %299 : vector<8x256xf32>
    %301 = vector.extract_strided_slice %264 {offsets = [5, 0], sizes = [1, 256], strides = [1, 1]} : vector<8x256xf32> to vector<1x256xf32>
    %302 = vector.extract_strided_slice %4 {offsets = [0, 1], sizes = [8, 1], strides = [1, 1]} : vector<8x4xf32> to vector<8x1xf32>
    %303 = vector.broadcast %302 : vector<8x1xf32> to vector<8x256xf32>
    %304 = vector.broadcast %301 : vector<1x256xf32> to vector<8x256xf32>
    %305 = arith.mulf %303, %304 : vector<8x256xf32>
    %306 = arith.addf %300, %305 : vector<8x256xf32>
    %307 = vector.extract_strided_slice %264 {offsets = [6, 0], sizes = [1, 256], strides = [1, 1]} : vector<8x256xf32> to vector<1x256xf32>
    %308 = vector.extract_strided_slice %4 {offsets = [0, 2], sizes = [8, 1], strides = [1, 1]} : vector<8x4xf32> to vector<8x1xf32>
    %309 = vector.broadcast %308 : vector<8x1xf32> to vector<8x256xf32>
    %310 = vector.broadcast %307 : vector<1x256xf32> to vector<8x256xf32>
    %311 = arith.mulf %309, %310 : vector<8x256xf32>
    %312 = arith.addf %306, %311 : vector<8x256xf32>
    %313 = vector.extract_strided_slice %264 {offsets = [7, 0], sizes = [1, 256], strides = [1, 1]} : vector<8x256xf32> to vector<1x256xf32>
    %314 = vector.extract_strided_slice %4 {offsets = [0, 3], sizes = [8, 1], strides = [1, 1]} : vector<8x4xf32> to vector<8x1xf32>
    %315 = vector.broadcast %314 : vector<8x1xf32> to vector<8x256xf32>
    %316 = vector.broadcast %313 : vector<1x256xf32> to vector<8x256xf32>
    %317 = arith.mulf %315, %316 : vector<8x256xf32>
    %318 = arith.addf %312, %317 : vector<8x256xf32>
    %319 = vector.broadcast %5 : vector<8x1xf32> to vector<8x256xf32>
    %320 = arith.addf %318, %319 : vector<8x256xf32>
    %cst_39 = arith.constant 0.000000e+00 : f32
    %321 = vector.broadcast %cst_39 : f32 to vector<8x256xf32>
    %322 = arith.maximumf %320, %321 : vector<8x256xf32>
    %323 = tpu.concatenate %293, %322 in 0 : vector<8x256xf32>, vector<8x256xf32> -> vector<16x256xf32>
    %c0_40 = arith.constant 0 : index
    %c0_41 = arith.constant 0 : index
    %324 = vector.load %arg3[%c0_40, %c0_41] : memref<16x256xf32, #tpu.memory_space<vmem>>, vector<16x256xf32>
    tpu.vector_store %arg3[%c0_40, %c0_41], %323 {strides = array<i32>} : memref<16x256xf32, #tpu.memory_space<vmem>>, vector<16x256xf32>,
    return
  }
  func.func @transform_0(%arg0: i32) -> (i32, i32) {
    %c0_i32 = arith.constant 0 : i32
    %c0_i32_0 = arith.constant 0 : i32
    %c0_i32_1 = arith.constant 0 : i32
    return %c0_i32, %c0_i32_0 : i32, i32
  }
  func.func @transform_1(%arg0: i32) -> (i32, i32) {
    %c0_i32 = arith.constant 0 : i32
    %c0_i32_0 = arith.constant 0 : i32
    %c0_i32_1 = arith.constant 0 : i32
    return %c0_i32, %c0_i32_0 : i32, i32
  }
  func.func @transform_2(%arg0: i32) -> (i32, i32) {
    %c0_i32 = arith.constant 0 : i32
    %c0_i32_0 = arith.constant 0 : i32
    %c0_i32_1 = arith.constant 0 : i32
    return %c0_i32, %c0_i32_0 : i32, i32
  }
}

</mosaic_0001>

<bundles_post_ra>
// kernel: tpu_custom_call.1
= control target key start
LH: loop header
LB: loop body
LE: loop exit
PB: predicated region body
PF: predicated region fallthrough
CT: control target
= control target key end

     0   :  { %7 = vsyncpa [#allocation3], 0  ;;  %s1996_s0 = inlined_call_operand.hbm [shape: f32[8,256], index: 0, kind: input, shape index: {}]   ;;  %s1997_s1 = inlined_call_operand.hbm [shape: f32[24,256], index: 1, kind: input, shape index: {}]   ;;  %s1998_s2 = inlined_call_operand.hbm [shape: f32[16,256], index: 2, kind: output, shape index: {}]  }
   0x1   :  { %8 = vsyncpa [#allocation6], 0 }
   0x2   :  { %9 = vsyncpa [#allocation4], 0  ;;  %s1106_s9 = smov [#allocation2]   ;;  %s1107_s11 = smov [#allocation5]  }
   0x3   :  { %s16_s10 = sshll.u32 %s1106_s9, 4  ;;  %s25_s12 = sshll.u32 %s1107_s11, 4  ;;  %s17_s10 = int_to_ptr.vmem [resolvable:$true] %s16_s10  ;;  %s26_s12 = int_to_ptr.vmem [resolvable:$true] %s25_s12 }
   0x4   :  { %s1048_s13 = scalar_lea.vmem %s17_s10, 256  ;;  %p1053_p1 = scmp.lt.s32.totalorder %s17_s10, %s17_s10 }
   0x5   :  { %p1049_p0 = scmp.ne.s32.totalorder %s17_s10, %s1048_s13  ;;  %p1054_p2 = scmp.lt.s32.totalorder %s1048_s13, %s1048_s13 }
   0x7   :  { %p1055_p3 = por %p1054_p2, %p1053_p1 }
   0x9   :  { %p1056_p4 = pnand %p1055_p3, %p1049_p0 }
   0xb   :  { %1059 = shalt.err (!%p1056_p4)
}
   0xc   :  { %19 = dma.hbm_to_vmem [thread:$0]  %s1996_s0, 256, %s17_s10, [#allocation3]  }
   0xd   :  { %s1068_s16 = scalar_lea.vmem %s26_s12, 768  ;;  %p1073_p6 = scmp.lt.s32.totalorder %s26_s12, %s26_s12 }
   0xe   :  { %p1069_p5 = scmp.ne.s32.totalorder %s26_s12, %s1068_s16  ;;  %p1074_p7 = scmp.lt.s32.totalorder %s1068_s16, %s1068_s16 }
  0x10   :  { %p1075_p8 = por %p1074_p7, %p1073_p6 }
  0x12   :  { %p1076_p9 = pnand %p1075_p8, %p1069_p5 }
  0x14   :  { %1079 = shalt.err (!%p1076_p9)
}
  0x15   :  { %s1108_s17 = smov 256   ;;  %s1109_s18 = smov 16  }
  0x16   :  { %31 = dma.hbm_to_vmem [thread:$0]  %s1997_s1, 768, %s26_s12, [#allocation6], %s1108_s17, %s1108_s17, %s1109_s18  }
  0x17   :  { %1100 = dma.done.wait [#allocation3], 256  }
  0x18   :  { %1101 = vsyncadd [#allocation3], 4294967040 }
  0x19   :  { %1102 = dma.done.wait [#allocation6], 768  }
  0x1a   :  { %1103 = vsyncadd [#allocation6], 4294966528  ;;  %v1110_v0 = vmov 0   ;;  %v1111_v1 = vmov 2   ;;  %v1186_v2 = vld [vmem:[#allocation5] sm:$0xff]  ;;  %v1188_v3 = vld [vmem:[#allocation2] sm:$0xff]  ;;  %v56_v35 = vlaneseq }
  0x1b   :  { %1008 = vset.pattern.permute.xlu1 %v1110_v0  ;;  %1010 = vset.pattern.permute.xlu0 %v1111_v1  ;;  %s1112_s0 = smov 34   ;;  %v1192_v4 = vld [vmem:[#allocation2 + $0x8] sm:$0xff]  ;;  %s1113_s1 = smov 33   ;;  %v1114_v5 = vmov 1   ;;  %v1116_v6 = vmov 12   ;;  %v1118_v7 = vmov 3  }
  0x1c   :  { %85 = vperm.xlu1 %1008, %v1186_v2   ;;  %52 = vrot.lane.b32.xlu0 %v1188_v3, %s1112_s0  ;;  %s1115_s21 = smov 32   ;;  %s1117_s22 = smov 31   ;;  %v1120_v8 = vmov 4   ;;  %v1121_v9 = vmov 5   ;;  %v1123_v10 = vmov 6   ;;  %v1125_v11 = vmov 7  }
  0x1d   :  { %s1119_s23 = smov 30   ;;  %s1122_s24 = smov 18   ;;  %v1126_v12 = vmov 8   ;;  %v1127_v13 = vmov 9   ;;  %v1128_v14 = vmov 10   ;;  %v1130_v15 = vmov 11  }
  0x1e   :  { %s1124_s25 = smov 17   ;;  %s1129_s26 = smov 15   ;;  %v1133_v16 = vmov 14   ;;  %v1137_v17 = vmov 17   ;;  %v1139_v18 = vmov 18   ;;  %v1140_v19 = vmov 19  }
  0x1f   :  { %s1131_s27 = smov 14   ;;  %s1132_s28 = smov 127   ;;  %v1141_v20 = vmov 13   ;;  %v1142_v21 = vmov 20   ;;  %v1143_v22 = vmov 21   ;;  %v1144_v23 = vmov 15  }
  0x20   :  { %92 = vrot.lane.b32.xlu1 %v1188_v3, %s1113_s1  ;;  %54 = vrot.lane.b32.xlu0 %v1192_v4, %s1112_s0  ;;  %s1134_s29 = smov 126   ;;  %s1135_s30 = smov 2   ;;  %v1247_v24 = vld [vmem:[#allocation5 + $0x20] sm:$0xff]  ;;  %v1249_v25 = vld [vmem:[#allocation5 + $0x28] sm:$0xff]  ;;  %v1145_v26 = vmov 22   ;;  %v1146_v29 = vmov 16  }
  0x21   :  { %1009 = vset.pattern.permute.xlu1 %v1114_v5  ;;  %s1136_s3 = smov 114   ;;  %s1138_s4 = smov 1   ;;  %vm2004_vm0 = vcmp.ge.f32.partialorder %v1247_v24, 1.0  ;;  %vm2002_vm1 = vcmp.ge.f32.partialorder %v1249_v25, 1.0  ;;  %vm50_vm2 = vcmp.ge.f32.partialorder %v1247_v24, 2.0  ;;  %vm51_vm3 = vcmp.ge.f32.partialorder %v1249_v25, 2.0 }
  0x22   :  { %v1257_v27 = vsel %vm2004_vm0, 1, %v1110_v0  ;;  %v1264_v28 = vsel %vm2002_vm1, 1, %v1110_v0  ;;  %v1272_v31 = vsel %vm50_vm2, 1, %v1110_v0  ;;  %v1147_v33 = vmov 23   ;;  %s1149_s5 = smov 113   ;;  %s1150_s6 = smov 94  }
  0x23   :  { %v101_v30 = vrot.slane %v1257_v27, 1  ;;  %v102_v32 = vrot.slane %v1264_v28, 1  ;;  %v1278_v34 = vsel %vm51_vm3, 1, %v1110_v0  ;;  %v63_v36 = vrot.slane %v1272_v31, 1  ;;  %s1152_s7 = smov 112   ;;  %s1153_s8 = smov 111  }
  0x24   :  { %122 = vperm.xlu1 %1009, %v1186_v2   ;;  %94 = vrot.lane.b32.xlu0 %v1192_v4, %s1113_s1  ;;  %v64_v38 = vrot.slane %v1278_v34, 1  ;;  %v1148_v41 = vmov 24   ;;  %v1306_v43 = vshrl.u32 %v56_v35, 7  ;;  %vm2000_vm10 = vcmp.lt.f32.partialorder %v1247_v24, 15.0  ;;  %s1154_s9 = smov 110   ;;  %s1155_s10 = smov 98  }
  0x25   :  { %vm1284_vm4 = vcmp.ne.s32.totalorder %v101_v30, 0  ;;  %vm1289_vm5 = vcmp.ne.s32.totalorder %v102_v32, 0  ;;  %vm1302_vm7 = vcmp.ne.s32.totalorder %v63_v36, 0  ;;  %vm1999_vm11 = vcmp.lt.f32.partialorder %v1249_v25, 15.0  ;;  %s1156_s11 = smov 97   ;;  %s1157_s12 = smov 96  }
  0x26   :  { %vm105_vm6 = vmand %vm50_vm2, %vm1284_vm4  ;;  %vm1312_vm9 = vcmp.ne.s32.totalorder %v64_v38, 0  ;;  %v1332_v47 = vsub.s32 0, %v1306_v43  ;;  %v1337_v49 = vsel %vm2000_vm10, 1, %v1110_v0  ;;  %v1151_v50 = vmov 25   ;;  %s1158_s13 = smov 95   ;;  %s1159_s14 = smov [#allocation7]  }
  0x27   :  { %vm106_vm8 = vmand %vm51_vm3, %vm1289_vm5  ;;  %v107_v45 = vsel %vm105_vm6, 1, %v1110_v0  ;;  %v1342_v51 = vsel %vm1999_vm11, 1, %v1110_v0  ;;  %v1344_v52 = vand.u32 127, %v56_v35  ;;  %v165_v58 = vrot.slane %v1337_v49, 1  ;;  %s941_s15 = sshll.u32 %s1159_s14, 4  ;;  %s942_s15 = int_to_ptr.vmem [resolvable:$true] %s941_s15 }
  0x28   :  { %131 = vrot.lane.b32.xlu1 %v1192_v4, %s1115_s21  ;;  %129 = vrot.lane.b32.xlu0 %v1188_v3, %s1115_s21  ;;  %vm67_vm12 = vmand %vm50_vm2, %vm1302_vm7  ;;  %v108_v46 = vsel %vm106_vm8, 1, %v1110_v0  ;;  %v112_v55 = vrot.slane %v107_v45, %v1332_v47  ;;  %v166_v60 = vrot.slane %v1342_v51, 1  ;;  %vm2001_vm15 = vcmp.lt.f32.partialorder %v1247_v24, 14.0  ;;  %s1080_s16 = scalar_lea.vmem %s942_s15, 512  ;;  %p1085_p11 = scmp.lt.s32.totalorder %s942_s15, %s942_s15 }
  0x29   :  { %1020 = vset.pattern.permute.xlu1 %v1116_v6  ;;  %vm68_vm13 = vmand %vm51_vm3, %vm1312_vm9  ;;  %v69_v53 = vsel %vm67_vm12, 1, %v1110_v0  ;;  %v116_v56 = vrot.slane %v108_v46, %v1332_v47  ;;  %vm96_vm14 = vcmp.lt.s32.totalorder %v1344_v52, 33  ;;  %vm2003_vm12 = vcmp.lt.f32.partialorder %v1249_v25, 14.0  ;;  %p1081_p10 = scmp.ne.s32.totalorder %s942_s15, %s1080_s16  ;;  %p1086_p12 = scmp.lt.s32.totalorder %s1080_s16, %s1080_s16 }
  0x2a   :  { %v70_v57 = vsel %vm68_vm13, 1, %v1110_v0  ;;  %v74_v61 = vrot.slane %v69_v53, %v1332_v47  ;;  %vm1358_vm6 = vcmp.eq.s32.totalorder %v112_v55, 1  ;;  %vm1367_vm13 = vcmp.ne.s32.totalorder %v165_v58, 0 }
  0x2b   :  { %v78_v62 = vrot.slane %v70_v57, %v1332_v47  ;;  %vm1362_vm8 = vcmp.eq.s32.totalorder %v116_v56, 1  ;;  %vm58_vm11 = vcmp.lt.s32.totalorder %v1344_v52, 34  ;;  %vm1381_vm10 = vcmp.ne.s32.totalorder %v166_v60, 0  ;;  %vm1411_vm1 = vmand %vm50_vm2, %vm1367_vm13  ;;  %p1087_p13 = por %p1086_p12, %p1085_p11 }
  0x2c   :  { %156 = vrot.lane.b32.xlu1 %v1188_v3, %s1117_s22  ;;  %149 = vperm.xlu0 %1010, %v1186_v2   ;;  %v171_v45 = vsel %vm1411_vm1, 1, %v1110_v0  ;;  %v2035_v55 = vmov 0  ;;  %v2037_v56 = vmov 0 }
  0x2d   :  { %p1088_p0 = pnand %p1087_p13, %p1081_p10 }
  0x30   :  { %158 = vrot.lane.b32.xlu1 %v1192_v4, %s1117_s22  ;;  %1011 = vset.pattern.permute.xlu0 %v1118_v7 }
  0x31   :  { %186 = vperm.xlu0 %1011, %v1186_v2  }
  0x34   :  { %193 = vrot.lane.b32.xlu1 %v1188_v3, %s1119_s23 }
  0x35   :  { %1012 = vset.pattern.permute.xlu0 %v1120_v8 }
  0x36   :  { %223 = vperm.xlu0 %1012, %v1186_v2  }
  0x38   :  { %195 = vrot.lane.b32.xlu1 %v1192_v4, %s1119_s23 }
  0x3a   :  { %1013 = vset.pattern.permute.xlu0 %v1121_v9 }
  0x3b   :  { %254 = vperm.xlu0 %1013, %v1186_v2  }
  0x3c   :  { %230 = vrot.lane.b32.xlu1 %v1188_v3, %s1122_s24 }
  0x3f   :  { %1014 = vset.pattern.permute.xlu0 %v1123_v10 }
  0x40   :  { %232 = vrot.lane.b32.xlu1 %v1192_v4, %s1122_s24  ;;  %285 = vperm.xlu0 %1014, %v1186_v2  }
  0x44   :  { %261 = vrot.lane.b32.xlu1 %v1188_v3, %s1124_s25  ;;  %1015 = vset.pattern.permute.xlu0 %v1125_v11  ;;  %v2021_v11 = vmov 0 }
  0x45   :  { %312 = vperm.xlu0 %1015, %v1186_v2   ;;  %v2022_v11 = vsel %vm1367_vm13, 4294967295, %v2021_v11 }
  0x48   :  { %263 = vrot.lane.b32.xlu1 %v1192_v4, %s1124_s25 }
  0x49   :  { %1016 = vset.pattern.permute.xlu0 %v1126_v12  ;;  %v1374_v12 = vsel %vm2001_vm15, 1, %v1110_v0  ;;  %vm1399_vm15 = vcmp.eq.s32.totalorder %v78_v62, 1 }
  0x4a   :  { %343 = vperm.xlu0 %1016, %v1186_v2  }
  0x4c   :  { %292 = vrot.lane.b32.xlu1 %v1188_v3, %s1109_s18 }
  0x4e   :  { %1017 = vset.pattern.permute.xlu0 %v1127_v13  ;;  %v1376_v13 = vld [vmem:[#allocation5 + $0x10] sm:$0xff] }
  0x4f   :  { %374 = vperm.xlu0 %1017, %v1186_v2  }
  0x50   :  { %294 = vrot.lane.b32.xlu1 %v1192_v4, %s1109_s18 }
  0x53   :  { %1018 = vset.pattern.permute.xlu0 %v1128_v14  ;;  %v2023_v14 = vmov 0 }
  0x54   :  { %319 = vrot.lane.b32.xlu1 %v1188_v3, %s1129_s26  ;;  %401 = vperm.xlu0 %1018, %v1186_v2   ;;  %v2024_v14 = vsel %vm1381_vm10, 4294967295, %v2023_v14 }
  0x58   :  { %321 = vrot.lane.b32.xlu1 %v1192_v4, %s1129_s26  ;;  %1019 = vset.pattern.permute.xlu0 %v1130_v15 }
  0x59   :  { %428 = vperm.xlu0 %1019, %v1186_v2  }
  0x5c   :  { %350 = vrot.lane.b32.xlu1 %v1188_v3, %s1131_s27 }
  0x5d   :  { %445 = vrot.lane.b32.xlu0 %v1192_v4, %s1132_s28 }
  0x5e   :  { %1022 = vset.pattern.permute.xlu0 %v1133_v16  ;;  %v139_v16 = vrot.slane %v1272_v31, %v1332_v47 }
  0x60   :  { %352 = vrot.lane.b32.xlu1 %v1192_v4, %s1131_s27 }
  0x61   :  { %470 = vrot.lane.b32.xlu0 %v1188_v3, %s1134_s29 }
  0x64   :  { %381 = vrot.lane.b32.xlu1 %v1188_v3, %s1135_s30 }
  0x65   :  { %490 = vperm.xlu0 %1022, %v1186_v2  }
  0x68   :  { %383 = vrot.lane.b32.xlu1 %v1192_v4, %s1135_s30 }
  0x69   :  { %497 = vrot.lane.b32.xlu0 %v1188_v3, %s1136_s3 }
  0x6a   :  { %1025 = vset.pattern.permute.xlu0 %v1137_v17  ;;  %v1397_v17 = vsel %vm2003_vm12, 1, %v1110_v0  ;;  %vm1426_vm12 = vcmp.eq.s32.totalorder %v139_v16, 1 }
  0x6b   :  { %v203_v35 = vrot.slane %v1397_v17, 1 }
  0x6c   :  { %408 = vrot.lane.b32.xlu1 %v1188_v3, %s1138_s4 }
  0x6d   :  { %579 = vperm.xlu0 %1025, %v1186_v2  }
  0x70   :  { %410 = vrot.lane.b32.xlu1 %v1192_v4, %s1138_s4 }
  0x71   :  { %1026 = vset.pattern.permute.xlu0 %v1139_v18 }
  0x72   :  { %610 = vperm.xlu0 %1026, %v1186_v2  }
  0x74   :  { %436 = vperm.xlu1 %1020, %v1186_v2  }
  0x76   :  { %1027 = vset.pattern.permute.xlu0 %v1140_v19 }
  0x77   :  { %641 = vperm.xlu0 %1027, %v1186_v2  }
  0x78   :  { %443 = vrot.lane.b32.xlu1 %v1188_v3, %s1132_s28 }
  0x79   :  { %1021 = vset.pattern.permute.xlu1 %v1141_v20 }
  0x7b   :  { %1028 = vset.pattern.permute.xlu0 %v1142_v21 }
  0x7c   :  { %463 = vperm.xlu1 %1021, %v1186_v2   ;;  %672 = vperm.xlu0 %1028, %v1186_v2  }
  0x80   :  { %472 = vrot.lane.b32.xlu1 %v1192_v4, %s1134_s29  ;;  %1029 = vset.pattern.permute.xlu0 %v1143_v22 }
  0x81   :  { %1023 = vset.pattern.permute.xlu1 %v1144_v23  ;;  %703 = vperm.xlu0 %1029, %v1186_v2   ;;  %v202_v23 = vrot.slane %v1374_v12, 1 }
  0x83   :  { %vm1442_vm0 = vcmp.ne.s32.totalorder %v202_v23, 0 }
  0x84   :  { %521 = vperm.xlu1 %1023, %v1186_v2   ;;  %v2036_v55 = vsel %vm1442_vm0, 4294967295, %v2035_v55  ;;  %vm206_vm1 = vmand %vm50_vm2, %vm1442_vm0  ;;  %vm2039_vm2 = vcmp.ge.f32.partialorder %v1247_v24, 1.0 }
  0x85   :  { %1030 = vset.pattern.permute.xlu0 %v1145_v26  ;;  %v208_v18 = vsel %vm206_vm1, 1, %v1110_v0 }
  0x86   :  { %730 = vperm.xlu0 %1030, %v1186_v2  }
  0x88   :  { %1024 = vset.pattern.permute.xlu1 %v1146_v29 }
  0x89   :  { %552 = vperm.xlu1 %1024, %v1186_v2  }
  0x8a   :  { %1031 = vset.pattern.permute.xlu0 %v1147_v33 }
  0x8b   :  { %761 = vperm.xlu0 %1031, %v1186_v2  }
  0x8d   :  { %499 = vrot.lane.b32.xlu1 %v1192_v4, %s1136_s3 }
  0x8e   :  { %1034 = vset.pattern.permute.xlu1 %v1110_v0  ;;  %v1294_v40 = vpop.permute.xlu0 %52 }
  0x8f   :  { %1032 = vset.pattern.permute.xlu0 %v1148_v41 }
  0x90   :  { %792 = vperm.xlu0 %1032, %v1186_v2  }
  0x91   :  { %528 = vrot.lane.b32.xlu1 %v1188_v3, %s1149_s5 }
  0x92   :  { %v55_v48 = vpop.permute.xlu0 %54 }
  0x93   :  { %v59_v26 = vsel %vm58_vm11, %v1294_v40, %v55_v48  ;;  %v60_v29 = vsel %vm58_vm11, %v55_v48, %v1294_v40 }
  0x94   :  { %768 = vrot.lane.b32.xlu0 %v1188_v3, %s1150_s6  ;;  %v82_v40 = vsel %vm1399_vm15, %v59_v26, 0.0  ;;  %vm1447_vm15 = vcmp.ne.s32.totalorder %v203_v35, 0 }
  0x95   :  { %530 = vrot.lane.b32.xlu1 %v1192_v4, %s1149_s5  ;;  %1033 = vset.pattern.permute.xlu0 %v1151_v50  ;;  %v2038_v56 = vsel %vm1447_vm15, 4294967295, %v2037_v56 }
  0x96   :  { %v95_v59 = vpop.permute.xlu0 %94 }
  0x97   :  { %v86_v54 = vpop.permute.xlu1 %85 }
  0x98   :  { %800 = vperm.xlu0 %1033, %v1186_v2   ;;  %v89_v58 = vmul.f32 %v86_v54, %v82_v40 }
  0x99   :  { %559 = vrot.lane.b32.xlu1 %v1188_v3, %s1152_s7 }
  0x9a   :  { %v130_v33 = vpop.permute.xlu0 %129 }
  0x9b   :  { %v93_v63 = vpop.permute.xlu1 %92 }
  0x9c   :  { %v97_v9 = vsel %vm96_vm14, %v93_v63, %v95_v59  ;;  %v98_v10 = vsel %vm96_vm14, %v95_v59, %v93_v63  ;;  %1036 = vset.pattern.permute.xlu0 %v1111_v1  ;;  %vm1386_vm14 = vcmp.eq.s32.totalorder %v74_v61, 1  ;;  %v143_v1 = vrot.slane %v1278_v34, %v1332_v47 }
  0x9d   :  { %561 = vrot.lane.b32.xlu1 %v1192_v4, %s1152_s7  ;;  %841 = vperm.xlu0 %1036, %v1376_v13   ;;  %v119_v20 = vsel %vm1358_vm6, %v98_v10, 0.0  ;;  %v120_v21 = vsel %vm1362_vm8, %v97_v9, 0.0  ;;  %vm170_vm6 = vmand %vm51_vm3, %vm1381_vm10  ;;  %vm133_vm8 = vcmp.lt.s32.totalorder %v1344_v52, 32  ;;  %v81_v38 = vsel %vm1386_vm14, %v60_v29, 0.0 }
  0x9e   :  { %v172_v46 = vsel %vm170_vm6, 1, %v1110_v0  ;;  %vm1438_vm11 = vcmp.eq.s32.totalorder %v143_v1, 1  ;;  %v88_v57 = vmul.f32 %v86_v54, %v81_v38  ;;  %v176_v59 = vrot.slane %v171_v45, %v1332_v47  ;;  %vm207_vm14 = vmand %vm51_vm3, %vm1447_vm15 }
  0x9f   :  { %v123_v19 = vpop.permute.xlu1 %122  ;;  %v180_v60 = vrot.slane %v172_v46, %v1332_v47  ;;  %vm237_vm3 = vmand %vm2039_vm2, %vm1302_vm7 }
  0xa0   :  { %v125_v30 = vmul.f32 %v123_v19, %v119_v20  ;;  %v126_v32 = vmul.f32 %v123_v19, %v120_v21  ;;  %vm181_vm6 = vcmp.eq.s32.totalorder %v176_v59, 1  ;;  %v209_v19 = vsel %vm207_vm14, 1, %v1110_v0 }
  0xa1   :  { %586 = vrot.lane.b32.xlu1 %v1188_v3, %s1153_s8  ;;  %1039 = vset.pattern.permute.xlu0 %v1120_v8  ;;  %vm197_vm14 = vcmp.lt.s32.totalorder %v1344_v52, 30  ;;  %v239_v45 = vsel %vm237_vm3, 1, %v1110_v0 }
  0xa2   :  { %v127_v2 = vadd.f32 %v125_v30, %v88_v57  ;;  %v128_v9 = vadd.f32 %v126_v32, %v89_v58  ;;  %v213_v32 = vrot.slane %v208_v18, %v1332_v47 }
  0xa3   :  { %v132_v41 = vpop.permute.xlu1 %131 }
  0xa4   :  { %v134_v48 = vsel %vm133_vm8, %v130_v33, %v132_v41  ;;  %v135_v50 = vsel %vm133_vm8, %v132_v41, %v130_v33  ;;  %vm182_vm8 = vcmp.eq.s32.totalorder %v180_v60, 1  ;;  %v217_v33 = vrot.slane %v209_v19, %v1332_v47 }
  0xa5   :  { %588 = vrot.lane.b32.xlu1 %v1192_v4, %s1153_s8  ;;  %v146_v62 = vsel %vm1426_vm12, %v135_v50, 0.0  ;;  %v147_v63 = vsel %vm1438_vm11, %v134_v48, 0.0  ;;  %vm160_vm12 = vcmp.lt.s32.totalorder %v1344_v52, 31  ;;  %vm2040_vm11 = vcmp.ge.f32.partialorder %v1249_v25, 1.0 }
  0xa6   :  { %vm238_vm1 = vmand %vm2040_vm11, %vm1312_vm9  ;;  %v244_v60 = vrot.slane %v239_v45, %v1332_v47  ;;  %v302_v45 = vrot.slane %v1257_v27, %v1332_v47 }
  0xa7   :  { %v157_v61 = vpop.permute.xlu1 %156  ;;  %v150_v6 = vpop.permute.xlu0 %149  ;;  %v240_v46 = vsel %vm238_vm1, 1, %v1110_v0  ;;  %vm2042_vm3 = vmmov %vm2040_vm11  ;;  %vm234_vm1 = vcmp.lt.s32.totalorder %v1344_v52, 18 }
  0xa8   :  { %v152_v54 = vmul.f32 %v150_v6, %v146_v62  ;;  %v153_v10 = vmul.f32 %v150_v6, %v147_v63  ;;  %vm269_vm11 = vmand %vm2042_vm3, %vm1289_vm5  ;;  %vm2043_vm3 = vcmp.ge.f32.partialorder %v1247_v24, 1.0 }
  0xa9   :  { %617 = vrot.lane.b32.xlu1 %v1188_v3, %s1154_s9 }
  0xaa   :  { %v154_v15 = vadd.f32 %v152_v54, %v127_v2  ;;  %v155_v16 = vadd.f32 %v153_v10, %v128_v9  ;;  %v271_v10 = vsel %vm269_vm11, 1, %v1110_v0  ;;  %vm326_vm11 = vmand %vm2043_vm3, %vm1367_vm13 }
  0xab   :  { %v159_v1 = vpop.permute.xlu1 %158 }
  0xac   :  { %v161_v20 = vsel %vm160_vm12, %v157_v61, %v159_v1  ;;  %v162_v21 = vsel %vm160_vm12, %v159_v1, %v157_v61  ;;  %v187_v22 = vpop.permute.xlu0 %186  ;;  %vm218_vm12 = vcmp.eq.s32.totalorder %v213_v32, 1  ;;  %v248_v61 = vrot.slane %v240_v46, %v1332_v47 }
  0xad   :  { %619 = vrot.lane.b32.xlu1 %v1192_v4, %s1154_s9  ;;  %v183_v23 = vsel %vm181_vm6, %v162_v21, 0.0  ;;  %v184_v26 = vsel %vm182_vm8, %v161_v20, 0.0  ;;  %vm219_vm6 = vcmp.eq.s32.totalorder %v217_v33, 1  ;;  %vm2041_vm8 = vmmov %vm2039_vm2  ;;  %v306_v46 = vrot.slane %v1264_v28, %v1332_v47 }
  0xae   :  { %v189_v29 = vmul.f32 %v187_v22, %v183_v23  ;;  %v190_v30 = vmul.f32 %v187_v22, %v184_v26  ;;  %vm268_vm2 = vmand %vm2041_vm8, %vm1284_vm4  ;;  %v279_v22 = vrot.slane %v271_v10, %v1332_v47 }
  0xaf   :  { %v194_v35 = vpop.permute.xlu1 %193  ;;  %v270_v54 = vsel %vm268_vm2, 1, %v1110_v0 }
  0xb0   :  { %v191_v36 = vadd.f32 %v189_v29, %v154_v15  ;;  %v192_v38 = vadd.f32 %v190_v30, %v155_v16  ;;  %v275_v21 = vrot.slane %v270_v54, %v1332_v47  ;;  %vm281_vm2 = vcmp.eq.s32.totalorder %v279_v22, 1 }
  0xb1   :  { %648 = vrot.lane.b32.xlu1 %v1188_v3, %s1155_s10  ;;  %v224_v41 = vpop.permute.xlu0 %223 }
  0xb2   :  { %vm280_vm8 = vcmp.eq.s32.totalorder %v275_v21, 1 }
  0xb3   :  { %v196_v40 = vpop.permute.xlu1 %195 }
  0xb4   :  { %v198_v48 = vsel %vm197_vm14, %v194_v35, %v196_v40  ;;  %v199_v50 = vsel %vm197_vm14, %v196_v40, %v194_v35  ;;  %vm249_vm14 = vcmp.eq.s32.totalorder %v244_v60, 1 }
  0xb5   :  { %650 = vrot.lane.b32.xlu1 %v1192_v4, %s1155_s10  ;;  %v220_v53 = vsel %vm218_vm12, %v199_v50, 0.0  ;;  %v221_v57 = vsel %vm219_vm6, %v198_v48, 0.0  ;;  %vm250_vm12 = vcmp.eq.s32.totalorder %v248_v61, 1  ;;  %vm265_vm6 = vcmp.lt.s32.totalorder %v1344_v52, 17 }
  0xb6   :  { %v226_v58 = vmul.f32 %v224_v41, %v220_v53  ;;  %v227_v59 = vmul.f32 %v224_v41, %v221_v57  ;;  %v255_v9 = vpop.permute.xlu0 %254 }
  0xb7   :  { %v231_v62 = vpop.permute.xlu1 %230 }
  0xb8   :  { %v228_v63 = vadd.f32 %v226_v58, %v191_v36  ;;  %v229_v6 = vadd.f32 %v227_v59, %v192_v38  ;;  %v328_v59 = vsel %vm326_vm11, 1, %v1110_v0 }
  0xb9   :  { %679 = vrot.lane.b32.xlu1 %v1188_v3, %s1156_s11  ;;  %v333_v54 = vrot.slane %v328_v59, %v1332_v47 }
  0xbb   :  { %v233_v2 = vpop.permute.xlu1 %232  ;;  %v286_v32 = vpop.permute.xlu0 %285 }
  0xbc   :  { %v235_v15 = vsel %vm234_vm1, %v231_v62, %v233_v2  ;;  %v236_v16 = vsel %vm234_vm1, %v233_v2, %v231_v62  ;;  %vm2044_vm1 = vcmp.ge.f32.partialorder %v1249_v25, 1.0 }
  0xbd   :  { %681 = vrot.lane.b32.xlu1 %v1192_v4, %s1156_s11  ;;  %v251_v1 = vsel %vm249_vm14, %v236_v16, 0.0  ;;  %v252_v18 = vsel %vm250_vm12, %v235_v15, 0.0  ;;  %vm327_vm14 = vmand %vm2044_vm1, %vm1381_vm10  ;;  %vm296_vm12 = vcmp.lt.s32.totalorder %v1344_v52, 16 }
  0xbe   :  { %v257_v19 = vmul.f32 %v255_v9, %v251_v1  ;;  %v258_v20 = vmul.f32 %v255_v9, %v252_v18  ;;  %v329_v60 = vsel %vm327_vm14, 1, %v1110_v0  ;;  %vm2046_vm11 = vmmov %vm2044_vm1  ;;  %vm323_vm14 = vcmp.lt.s32.totalorder %v1344_v52, 15 }
  0xbf   :  { %v262_v23 = vpop.permute.xlu1 %261  ;;  %v337_v10 = vrot.slane %v329_v60, %v1332_v47  ;;  %vm358_vm1 = vmand %vm2046_vm11, %vm1447_vm15  ;;  %vm385_vm11 = vcmp.lt.s32.totalorder %v1344_v52, 2 }
  0xc0   :  { %v259_v26 = vadd.f32 %v257_v19, %v228_v63  ;;  %v260_v29 = vadd.f32 %v258_v20, %v229_v6  ;;  %v313_v58 = vpop.permute.xlu0 %312  ;;  %v360_v21 = vsel %vm358_vm1, 1, %v1110_v0 }
  0xc1   :  { %710 = vrot.lane.b32.xlu1 %v1188_v3, %s1157_s12 }
  0xc3   :  { %v264_v30 = vpop.permute.xlu1 %263 }
  0xc4   :  { %v266_v33 = vsel %vm265_vm6, %v262_v23, %v264_v30  ;;  %v267_v35 = vsel %vm265_vm6, %v264_v30, %v262_v23  ;;  %vm307_vm6 = vcmp.eq.s32.totalorder %v302_v45, 1 }
  0xc5   :  { %712 = vrot.lane.b32.xlu1 %v1192_v4, %s1157_s12  ;;  %v282_v36 = vsel %vm280_vm8, %v267_v35, 0.0  ;;  %v283_v38 = vsel %vm281_vm2, %v266_v33, 0.0  ;;  %vm308_vm8 = vcmp.eq.s32.totalorder %v306_v46, 1  ;;  %vm2045_vm2 = vmmov %vm2043_vm3  ;;  %v344_v19 = vpop.permute.xlu0 %343  ;;  %v368_v35 = vrot.slane %v360_v21, %v1332_v47 }
  0xc6   :  { %v288_v40 = vmul.f32 %v286_v32, %v282_v36  ;;  %v289_v41 = vmul.f32 %v286_v32, %v283_v38  ;;  %vm357_vm3 = vmand %vm2045_vm2, %vm1442_vm0 }
  0xc7   :  { %v293_v48 = vpop.permute.xlu1 %292  ;;  %v359_v20 = vsel %vm357_vm3, 1, %v1110_v0  ;;  %vm370_vm3 = vcmp.eq.s32.totalorder %v368_v35, 1 }
  0xc8   :  { %v290_v50 = vadd.f32 %v288_v40, %v259_v26  ;;  %v291_v53 = vadd.f32 %v289_v41, %v260_v29  ;;  %v364_v33 = vrot.slane %v359_v20, %v1332_v47  ;;  %v1544_v41 = vsub.s32 1, %v1306_v43 }
  0xc9   :  { %737 = vrot.lane.b32.xlu1 %v1188_v3, %s1158_s13 }
  0xca   :  { %vm369_vm2 = vcmp.eq.s32.totalorder %v364_v33, 1  ;;  %v375_v46 = vpop.permute.xlu0 %374  ;;  %v395_v60 = vrot.slane %v1278_v34, %v1544_v41 }
  0xcb   :  { %v295_v57 = vpop.permute.xlu1 %294 }
  0xcc   :  { %v297_v61 = vsel %vm296_vm12, %v293_v48, %v295_v57  ;;  %v298_v62 = vsel %vm296_vm12, %v295_v57, %v293_v48  ;;  %vm338_vm12 = vcmp.eq.s32.totalorder %v333_v54, 1 }
  0xcd   :  { %739 = vrot.lane.b32.xlu1 %v1192_v4, %s1158_s13  ;;  %v309_v63 = vsel %vm307_vm6, %v298_v62, 0.0  ;;  %v310_v6 = vsel %vm308_vm8, %v297_v61, 0.0  ;;  %vm339_vm6 = vcmp.eq.s32.totalorder %v337_v10, 1  ;;  %vm354_vm8 = vcmp.lt.s32.totalorder %v1344_v52, 14 }
  0xce   :  { %v315_v2 = vmul.f32 %v313_v58, %v309_v63  ;;  %v316_v9 = vmul.f32 %v313_v58, %v310_v6 }
  0xcf   :  { %v320_v15 = vpop.permute.xlu1 %319 }
  0xd0   :  { %v317_v16 = vadd.f32 %v315_v2, %v290_v50  ;;  %v318_v1 = vadd.f32 %v316_v9, %v291_v53  ;;  %v402_v2 = vpop.permute.xlu0 %401 }
  0xd1   :  { %770 = vrot.lane.b32.xlu1 %v1192_v4, %s1150_s6 }
  0xd3   :  { %v322_v18 = vpop.permute.xlu1 %321 }
  0xd4   :  { %v324_v22 = vsel %vm323_vm14, %v320_v15, %v322_v18  ;;  %v325_v23 = vsel %vm323_vm14, %v322_v18, %v320_v15  ;;  %vm397_vm14 = vcmp.eq.s32.totalorder %v395_v60, 1  ;;  %v418_v15 = vrot.slane %v1257_v27, %v1544_v41  ;;  %v429_v20 = vpop.permute.xlu0 %428 }
  0xd5   :  { %809 = vperm.xlu1 %1034, %v1376_v13   ;;  %v340_v26 = vsel %vm338_vm12, %v325_v23, 0.0  ;;  %v341_v29 = vsel %vm339_vm6, %v324_v22, 0.0  ;;  %vm412_vm12 = vcmp.lt.s32.totalorder %v1344_v52, 1  ;;  %v453_v27 = vrot.slane %v1337_v49, %v1544_v41 }
  0xd6   :  { %v346_v30 = vmul.f32 %v344_v19, %v340_v26  ;;  %v347_v32 = vmul.f32 %v344_v19, %v341_v29  ;;  %vm423_vm6 = vcmp.eq.s32.totalorder %v418_v15, 1 }
  0xd7   :  { %v351_v36 = vpop.permute.xlu1 %350 }
  0xd8   :  { %v348_v38 = vadd.f32 %v346_v30, %v317_v16  ;;  %v349_v40 = vadd.f32 %v347_v32, %v318_v1  ;;  %v422_v16 = vrot.slane %v1264_v28, %v1544_v41  ;;  %v457_v28 = vrot.slane %v1342_v51, %v1544_v41 }
  0xd9   :  { %1035 = vset.pattern.permute.xlu1 %v1114_v5  ;;  %v391_v5 = vrot.slane %v1272_v31, %v1544_v41 }
  0xda   :  { %825 = vperm.xlu1 %1035, %v1376_v13  }
  0xdb   :  { %v353_v45 = vpop.permute.xlu1 %352  ;;  %vm396_vm1 = vcmp.eq.s32.totalorder %v391_v5, 1 }
  0xdc   :  { %v355_v48 = vsel %vm354_vm8, %v351_v36, %v353_v45  ;;  %v356_v50 = vsel %vm354_vm8, %v353_v45, %v351_v36  ;;  %vm424_vm8 = vcmp.eq.s32.totalorder %v422_v16, 1 }
  0xdd   :  { %v371_v53 = vsel %vm369_vm2, %v356_v50, 0.0  ;;  %v372_v57 = vsel %vm370_vm3, %v355_v48, 0.0  ;;  %vm447_vm2 = vcmp.lt.s32.totalorder %v1344_v52, 127  ;;  %vm458_vm3 = vcmp.eq.s32.totalorder %v453_v27, 1 }
  0xde   :  { %v377_v58 = vmul.f32 %v375_v46, %v371_v53  ;;  %v378_v59 = vmul.f32 %v375_v46, %v372_v57  ;;  %1037 = vset.pattern.permute.xlu1 %v1118_v7 }
  0xdf   :  { %857 = vperm.xlu1 %1037, %v1376_v13   ;;  %v382_v61 = vpop.permute.xlu1 %381 }
  0xe0   :  { %v379_v62 = vadd.f32 %v377_v58, %v348_v38  ;;  %v380_v63 = vadd.f32 %v378_v59, %v349_v40  ;;  %v446_v38 = vpop.permute.xlu0 %445 }
  0xe3   :  { %v384_v6 = vpop.permute.xlu1 %383  ;;  %1038 = vset.pattern.permute.xlu1 %v1120_v8 }
  0xe4   :  { %v386_v7 = vsel %vm385_vm11, %v382_v61, %v384_v6  ;;  %v387_v9 = vsel %vm385_vm11, %v384_v6, %v382_v61  ;;  %873 = vperm.xlu1 %1038, %v1376_v13   ;;  %vm459_vm11 = vcmp.eq.s32.totalorder %v457_v28, 1 }
  0xe5   :  { %v398_v31 = vsel %vm396_vm1, %v387_v9, 0.0  ;;  %v399_v54 = vsel %vm397_vm14, %v386_v7, 0.0  ;;  %v471_v7 = vpop.permute.xlu0 %470  ;;  %vm2047_vm1 = vcmp.lt.f32.partialorder %v1247_v24, 15.0 }
  0xe6   :  { %v404_v34 = vmul.f32 %v402_v2, %v398_v31  ;;  %v405_v10 = vmul.f32 %v402_v2, %v399_v54  ;;  %vm504_vm14 = vmand %vm2047_vm1, %vm1302_vm7 }
  0xe7   :  { %v409_v1 = vpop.permute.xlu1 %408 }
  0xe8   :  { %v406_v18 = vadd.f32 %v404_v34, %v379_v62  ;;  %v407_v19 = vadd.f32 %v405_v10, %v380_v63 }
  0xe9   :  { %v1587_v54 = vpop.permute.xlu0 %490 }
  0xeb   :  { %v411_v8 = vpop.permute.xlu1 %410 }
  0xec   :  { %v413_v13 = vsel %vm412_vm12, %v409_v1, %v411_v8  ;;  %v414_v21 = vsel %vm412_vm12, %v411_v8, %v409_v1  ;;  %vm2048_vm12 = vcmp.lt.f32.partialorder %v1249_v25, 15.0 }
  0xed   :  { %v425_v22 = vsel %vm423_vm6, %v414_v21, 0.0  ;;  %v426_v23 = vsel %vm424_vm8, %v413_v13, 0.0  ;;  %v498_v10 = vpop.permute.xlu0 %497  ;;  %vm505_vm6 = vmand %vm2048_vm12, %vm1312_vm9  ;;  %v480_v21 = vrot.slane %v1374_v12, %v1544_v41 }
  0xee   :  { %v431_v26 = vmul.f32 %v429_v20, %v425_v22  ;;  %v432_v29 = vmul.f32 %v429_v20, %v426_v23  ;;  %vm2049_vm8 = vmmov %vm2047_vm1  ;;  %v484_v22 = vrot.slane %v1397_v17, %v1544_v41 }
  0xef   :  { %v437_v30 = vpop.permute.xlu1 %436 }
  0xf0   :  { %v433_v32 = vadd.f32 %v431_v26, %v406_v18  ;;  %v434_v33 = vadd.f32 %v432_v29, %v407_v19  ;;  %v439_v35 = vmul.f32 %v437_v30, %v1188_v3  ;;  %v440_v36 = vmul.f32 %v437_v30, %v1192_v4 }
  0xf1   :  { %v1605_v16 = vpop.permute.xlu0 %579  ;;  %v506_v18 = vsel %vm504_vm14, 1, %v1110_v0  ;;  %v507_v19 = vsel %vm505_vm6, 1, %v1110_v0 }
  0xf2   :  { %v441_v40 = vadd.f32 %v439_v35, %v433_v32  ;;  %v442_v45 = vadd.f32 %v440_v36, %v434_v33  ;;  %v511_v23 = vrot.slane %v506_v18, %v1332_v47  ;;  %v515_v26 = vrot.slane %v507_v19, %v1332_v47 }
  0xf3   :  { %v444_v46 = vpop.permute.xlu1 %443  ;;  %v569_v32 = vrot.slane %v1337_v49, %v1332_v47  ;;  %v573_v33 = vrot.slane %v1342_v51, %v1332_v47 }
  0xf4   :  { %v448_v48 = vsel %vm447_vm2, %v444_v46, %v446_v38  ;;  %v449_v50 = vsel %vm447_vm2, %v446_v38, %v444_v46  ;;  %vm535_vm2 = vmand %vm2049_vm8, %vm1284_vm4 }
  0xf5   :  { %v460_v57 = vsel %vm458_vm3, %v448_v48, 0.0  ;;  %v461_v58 = vsel %vm459_vm11, %v449_v50, 0.0  ;;  %vm2050_vm3 = vmmov %vm2048_vm12  ;;  %v537_v8 = vsel %vm535_vm2, 1, %v1110_v0  ;;  %v1621_v13 = vpop.permute.xlu0 %610 }
  0xf6   :  { %vm536_vm11 = vmand %vm2050_vm3, %vm1289_vm5  ;;  %v542_v29 = vrot.slane %v537_v8, %v1332_v47 }
  0xf7   :  { %v464_v53 = vpop.permute.xlu1 %463  ;;  %v538_v20 = vsel %vm536_vm11, 1, %v1110_v0  ;;  %vm593_vm12 = vmand %vm2047_vm1, %vm1367_vm13  ;;  %vm1719_vm13 = vcmp.eq.s32.totalorder %v569_v32, 1 }
  0xf8   :  { %v466_v59 = vmul.f32 %v464_v53, %v460_v57  ;;  %v467_v5 = vmul.f32 %v464_v53, %v461_v58  ;;  %vm2051_vm14 = vmmov %vm2050_vm3  ;;  %v546_v27 = vrot.slane %v538_v20, %v1332_v47  ;;  %v595_v35 = vsel %vm593_vm12, 1, %v1110_v0 }
  0xf9   :  { %vm594_vm6 = vmand %vm2051_vm14, %vm1381_vm10  ;;  %vm1662_vm14 = vcmp.eq.s32.totalorder %v480_v21, 1  ;;  %vm1688_vm10 = vcmp.eq.s32.totalorder %v542_v29, 1  ;;  %v600_v53 = vrot.slane %v595_v35, %v1332_v47 }
  0xfa   :  { %v1567_v60 = vadd.f32 %v466_v59, %v441_v40  ;;  %v1569_v3 = vadd.f32 %v467_v5, %v442_v45  ;;  %vm2052_vm8 = vmmov %vm2047_vm1  ;;  %v596_v36 = vsel %vm594_vm6, 1, %v1110_v0  ;;  %v1659_v40 = vpop.permute.xlu0 %641  ;;  %vm2061_vm6 = vcmp.lt.f32.partialorder %v1247_v24, 14.0 }
  0xfb   :  { %v1571_v4 = vpop.permute.xlu1 %472  ;;  %vm1641_vm2 = vmand %vm2052_vm8, %vm1442_vm0  ;;  %vm1666_vm8 = vcmp.eq.s32.totalorder %v484_v22, 1  ;;  %vm1683_vm1 = vcmp.eq.s32.totalorder %v515_v26, 1  ;;  %v604_v57 = vrot.slane %v596_v36, %v1332_v47  ;;  %vm2071_vm0 = vcmp.lt.f32.partialorder %v1247_v24, 14.0 }
  0xfc   :  { %vm1655_vm11 = vmand %vm2050_vm3, %vm1447_vm15  ;;  %vm1679_vm15 = vcmp.eq.s32.totalorder %v511_v23, 1  ;;  %v626_v58 = vsel %vm1641_vm2, 1, %v1110_v0  ;;  %vm1723_vm2 = vcmp.eq.s32.totalorder %v573_v33, 1 }
  0xfd   :  { %vm1675_vm3 = vmand %vm2061_vm6, %vm1302_vm7  ;;  %vm2070_vm7 = vcmp.lt.f32.partialorder %v1249_v25, 14.0  ;;  %v627_v59 = vsel %vm1655_vm11, 1, %v1110_v0  ;;  %v631_v23 = vrot.slane %v626_v58, %v1332_v47  ;;  %vm1761_vm11 = vcmp.eq.s32.totalorder %v604_v57, 1 }
  0xfe   :  { %vm656_vm6 = vmand %vm2070_vm7, %vm1312_vm9  ;;  %vm1714_vm9 = vcmp.eq.s32.totalorder %v546_v27, 1  ;;  %v1727_v37 = vpop.permute.xlu0 %672  ;;  %v657_v21 = vsel %vm1675_vm3, 1, %v1110_v0  ;;  %v635_v26 = vrot.slane %v627_v59, %v1332_v47  ;;  %vm2083_vm3 = vcmp.lt.s32.totalorder %v1344_v52, 114 }
  0xff   :  { %v1573_v61 = vpop.permute.xlu1 %521  ;;  %vm1710_vm12 = vmand %vm2071_vm0, %vm1284_vm4  ;;  %vm2080_vm0 = vcmp.lt.s32.totalorder %v1344_v52, 126  ;;  %v658_v22 = vsel %vm656_vm6, 1, %v1110_v0  ;;  %v662_v35 = vrot.slane %v657_v21, %v1332_v47 }
 0x100   :  { %v475_v8 = vsel %vm2080_vm0, %v471_v7, %v1571_v4  ;;  %vm2081_vm4 = vmmov %vm2080_vm0  ;;  %v666_v36 = vrot.slane %v658_v22, %v1332_v47 }
 0x101   :  { %v476_v20 = vsel %vm2081_vm4, %v1571_v4, %v471_v7  ;;  %vm2082_vm0 = vmmov %vm2070_vm7  ;;  %v688_v4 = vsel %vm1710_vm12, 1, %v1110_v0  ;;  %vm1757_vm4 = vcmp.eq.s32.totalorder %v600_v53, 1  ;;  %v487_v32 = vsel %vm1662_vm14, %v475_v8, 0.0 }
 0x102   :  { %vm687_vm7 = vmand %vm2082_vm0, %vm1289_vm5  ;;  %v488_v33 = vsel %vm1666_vm8, %v476_v20, 0.0  ;;  %vm621_vm5 = vcmp.lt.s32.totalorder %v1344_v52, 110  ;;  %vm652_vm12 = vcmp.lt.s32.totalorder %v1344_v52, 98  ;;  %vm2089_vm14 = vcmp.lt.s32.totalorder %v1344_v52, 113  ;;  %v1797_v57 = vpop.permute.xlu0 %703 }
 0x103   :  { %vm2084_vm6 = vmmov %vm2083_vm3  ;;  %vm1787_vm0 = vcmp.eq.s32.totalorder %v631_v23, 1  ;;  %v493_v58 = vmul.f32 %v1587_v54, %v487_v32  ;;  %v494_v59 = vmul.f32 %v1587_v54, %v488_v33 }
 0x104   :  { %v1575_v62 = vpop.permute.xlu1 %552  ;;  %vm2090_vm8 = vmmov %vm2089_vm14 }
 0x105   :  { %v496_v50 = vadd.f32 %v494_v59, %v1569_v3 }
 0x108   :  { %v1577_v63 = vpop.permute.xlu1 %499 }
 0x109   :  { %v502_v7 = vsel %vm2083_vm3, %v498_v10, %v1577_v63  ;;  %v503_v27 = vsel %vm2084_vm6, %v1577_v63, %v498_v10  ;;  %v689_v63 = vsel %vm687_vm7, 1, %v1110_v0  ;;  %v693_v10 = vrot.slane %v688_v4, %v1332_v47 }
 0x10a   :  { %v518_v38 = vsel %vm1679_vm15, %v502_v7, 0.0  ;;  %v519_v49 = vsel %vm1683_vm1, %v503_v27, 0.0  ;;  %vm1791_vm7 = vcmp.eq.s32.totalorder %v635_v26, 1  ;;  %vm2095_vm15 = vcmp.lt.s32.totalorder %v1344_v52, 112 }
 0x10b   :  { %vm2096_vm1 = vmmov %vm2095_vm15  ;;  %vm1809_vm3 = vcmp.eq.s32.totalorder %v662_v35, 1  ;;  %vm1813_vm6 = vcmp.eq.s32.totalorder %v666_v36, 1  ;;  %v697_v54 = vrot.slane %v689_v63, %v1332_v47  ;;  %v524_v20 = vmul.f32 %v1573_v61, %v518_v38 }
 0x10c   :  { %v1579_v6 = vpop.permute.xlu1 %528  ;;  %v525_v21 = vmul.f32 %v1573_v61, %v519_v49  ;;  %v720_v4 = vrot.slane %v1374_v12, %v1332_v47  ;;  %v724_v7 = vrot.slane %v1397_v17, %v1332_v47  ;;  %v495_v61 = vadd.f32 %v493_v58, %v1567_v60 }
 0x110   :  { %v1581_v2 = vpop.permute.xlu1 %530 }
 0x111   :  { %v533_v51 = vsel %vm2089_vm14, %v1579_v6, %v1581_v2  ;;  %v534_v45 = vsel %vm2090_vm8, %v1581_v2, %v1579_v6  ;;  %vm2106_vm8 = vcmp.lt.f32.partialorder %v1247_v24, 14.0  ;;  %vm2112_vm14 = vcmp.lt.f32.partialorder %v1249_v25, 14.0 }
 0x112   :  { %v549_v22 = vsel %vm1688_vm10, %v533_v51, 0.0  ;;  %vm2101_vm10 = vcmp.lt.s32.totalorder %v1344_v52, 111 }
 0x113   :  { %v555_v17 = vmul.f32 %v1575_v62, %v549_v22 }
 0x114   :  { %v1583_v9 = vpop.permute.xlu1 %559 }
 0x118   :  { %v1585_v31 = vpop.permute.xlu1 %561 }
 0x119   :  { %v564_v6 = vsel %vm2095_vm15, %v1583_v9, %v1585_v31  ;;  %v565_v2 = vsel %vm2096_vm1, %v1585_v31, %v1583_v9  ;;  %v550_v9 = vsel %vm1714_vm9, %v534_v45, 0.0  ;;  %vm1843_vm9 = vcmp.eq.s32.totalorder %v693_v10, 1 }
 0x11a   :  { %v576_v31 = vsel %vm1719_vm13, %v564_v6, 0.0  ;;  %v577_v23 = vsel %vm1723_vm2, %v565_v2, 0.0  ;;  %vm2102_vm13 = vmmov %vm2101_vm10  ;;  %vm2105_vm2 = vnez %v2022_v11  ;;  %v556_v60 = vmul.f32 %v1575_v62, %v550_v9 }
 0x11b   :  { %vm1851_vm15 = vmand %vm2106_vm8, %vm2105_vm2  ;;  %vm1857_vm1 = vcmp.eq.s32.totalorder %v697_v54, 1  ;;  %v526_v11 = vadd.f32 %v524_v20, %v495_v61  ;;  %v582_v27 = vmul.f32 %v1605_v16, %v576_v31  ;;  %v583_v32 = vmul.f32 %v1605_v16, %v577_v23 }
 0x11c   :  { %v1589_v34 = vpop.permute.xlu1 %586  ;;  %vm1886_vm8 = vcmp.eq.s32.totalorder %v724_v7, 1  ;;  %v746_v28 = vsel %vm1851_vm15, 1, %v1110_v0  ;;  %vm2122_vm15 = vcmp.lt.f32.partialorder %v1249_v25, 14.0 }
 0x11d   :  { %v557_v10 = vadd.f32 %v555_v17, %v526_v11  ;;  %v751_v6 = vrot.slane %v746_v28, %v1332_v47 }
 0x120   :  { %v1595_v15 = vpop.permute.xlu1 %588 }
 0x121   :  { %v591_v5 = vsel %vm2101_vm10, %v1589_v34, %v1595_v15  ;;  %v592_v18 = vsel %vm2102_vm13, %v1595_v15, %v1589_v34  ;;  %v1861_v34 = vpop.permute.xlu0 %730  ;;  %vm714_vm10 = vcmp.lt.s32.totalorder %v1344_v52, 96  ;;  %vm2111_vm13 = vnez %v2024_v14 }
 0x122   :  { %vm745_vm2 = vmand %vm2112_vm14, %vm2111_vm13  ;;  %v527_v15 = vadd.f32 %v525_v21, %v496_v50  ;;  %v607_v62 = vsel %vm1757_vm4, %v591_v5, 0.0  ;;  %v608_v33 = vsel %vm1761_vm11, %v592_v18, 0.0  ;;  %vm1882_vm14 = vcmp.eq.s32.totalorder %v720_v4, 1 }
 0x123   :  { %v747_v39 = vsel %vm745_vm2, 1, %v1110_v0  ;;  %vm2117_vm11 = vnez %v2036_v55  ;;  %vm2118_vm4 = vcmp.lt.f32.partialorder %v1247_v24, 14.0  ;;  %v613_v51 = vmul.f32 %v1621_v13, %v607_v62 }
 0x124   :  { %v1611_v1 = vpop.permute.xlu1 %617  ;;  %v558_v38 = vadd.f32 %v556_v60, %v527_v15  ;;  %v614_v45 = vmul.f32 %v1621_v13, %v608_v33  ;;  %v584_v24 = vadd.f32 %v582_v27, %v557_v10  ;;  %v755_v2 = vrot.slane %v747_v39, %v1332_v47 }
 0x126   :  { %v585_v55 = vadd.f32 %v583_v32, %v558_v38  ;;  %v615_v8 = vadd.f32 %v613_v51, %v584_v24 }
 0x128   :  { %v1634_v30 = vpop.permute.xlu1 %619  ;;  %v616_v21 = vadd.f32 %v614_v45, %v585_v55 }
 0x129   :  { %v622_v14 = vsel %vm621_vm5, %v1611_v1, %v1634_v30  ;;  %v623_v35 = vsel %vm621_vm5, %v1634_v30, %v1611_v1  ;;  %vm1906_vm5 = vmand %vm2118_vm4, %vm2117_vm11 }
 0x12a   :  { %v638_v58 = vsel %vm1787_vm0, %v622_v14, 0.0  ;;  %v639_v59 = vsel %vm1791_vm7, %v623_v35, 0.0  ;;  %vm2123_vm0 = vcmp.lt.s32.totalorder %v1344_v52, 97  ;;  %v777_v44 = vsel %vm1906_vm5, 1, %v1110_v0 }
 0x12b   :  { %vm2124_vm7 = vmmov %vm2123_vm0  ;;  %v644_v46 = vmul.f32 %v1659_v40, %v638_v58  ;;  %v645_v54 = vmul.f32 %v1659_v40, %v639_v59 }
 0x12c   :  { %v1692_v42 = vpop.permute.xlu1 %648 }
 0x12d   :  { %v646_v7 = vadd.f32 %v644_v46, %v615_v8  ;;  %v647_v61 = vadd.f32 %v645_v54, %v616_v21  ;;  %v906_v46 = vsub.s32 6, %v1306_v43  ;;  %v862_v54 = vsub.s32 3, %v1306_v43 }
 0x130   :  { %v1742_v29 = vpop.permute.xlu1 %650 }
 0x131   :  { %v653_v1 = vsel %vm652_vm12, %v1692_v42, %v1742_v29  ;;  %v654_v30 = vsel %vm652_vm12, %v1742_v29, %v1692_v42  ;;  %vm2121_vm12 = vnez %v2038_v56  ;;  %v762_v42 = vpop.permute.xlu0 %761 }
 0x132   :  { %vm776_vm13 = vmand %vm2122_vm15, %vm2121_vm12  ;;  %v669_v13 = vsel %vm1809_vm3, %v653_v1, 0.0  ;;  %v670_v53 = vsel %vm1813_vm6, %v654_v30, 0.0  ;;  %vm741_vm3 = vcmp.lt.s32.totalorder %v1344_v52, 95  ;;  %vm1957_vm6 = vcmp.eq.s32.totalorder %v751_v6, 1 }
 0x133   :  { %v778_v20 = vsel %vm776_vm13, 1, %v1110_v0  ;;  %v676_v31 = vmul.f32 %v1727_v37, %v670_v53  ;;  %v782_v0 = vrot.slane %v777_v44, %v1332_v47  ;;  %v918_v44 = vsub.s32 7, %v1306_v43 }
 0x134   :  { %v1795_v48 = vpop.permute.xlu1 %679  ;;  %v786_v4 = vrot.slane %v778_v20, %v1332_v47 }
 0x135   :  { %v793_v5 = vpop.permute.xlu0 %792  ;;  %v678_v3 = vadd.f32 %v676_v31, %v647_v61 }
 0x136   :  { %vm788_vm2 = vcmp.eq.s32.totalorder %v786_v4, 1 }
 0x138   :  { %v682_v26 = vpop.permute.xlu1 %681 }
 0x139   :  { %v684_v56 = vsel %vm2123_vm0, %v1795_v48, %v682_v26  ;;  %v685_v25 = vsel %vm2124_vm7, %v682_v26, %v1795_v48  ;;  %v675_v48 = vmul.f32 %v1727_v37, %v669_v13  ;;  %v769_v16 = vpop.permute.xlu0 %768  ;;  %v846_v13 = vsub.s32 2, %v1306_v43 }
 0x13a   :  { %v700_v40 = vsel %vm1843_vm9, %v684_v56, 0.0  ;;  %v701_v23 = vsel %vm1857_vm1, %v685_v25, 0.0  ;;  %vm1961_vm9 = vcmp.eq.s32.totalorder %v755_v2, 1  ;;  %vm772_vm1 = vcmp.lt.s32.totalorder %v1344_v52, 94 }
 0x13b   :  { %v706_v18 = vmul.f32 %v1797_v57, %v700_v40  ;;  %v707_v19 = vmul.f32 %v1797_v57, %v701_v23  ;;  %v677_v60 = vadd.f32 %v675_v48, %v646_v7  ;;  %v894_v2 = vsub.s32 5, %v1306_v43 }
 0x13c   :  { %v711_v36 = vpop.permute.xlu1 %710  ;;  %v882_v25 = vsub.s32 4, %v1306_v43 }
 0x13d   :  { %v708_v14 = vadd.f32 %v706_v18, %v677_v60  ;;  %v709_v35 = vadd.f32 %v707_v19, %v678_v3  ;;  %v801_v24 = vpop.permute.xlu0 %800 }
 0x140   :  { %v713_v29 = vpop.permute.xlu1 %712 }
 0x141   :  { %v715_v22 = vsel %vm714_vm10, %v711_v36, %v713_v29  ;;  %v716_v9 = vsel %vm714_vm10, %v713_v29, %v711_v36  ;;  %vm787_vm10 = vcmp.eq.s32.totalorder %v782_v0, 1  ;;  %v842_v23 = vpop.permute.xlu0 %841 }
 0x142   :  { %v727_v50 = vsel %vm1882_vm14, %v715_v22, 0.0  ;;  %v728_v37 = vsel %vm1886_vm8, %v716_v9, 0.0 }
 0x143   :  { %v733_v15 = vmul.f32 %v1861_v34, %v727_v50  ;;  %v734_v27 = vmul.f32 %v1861_v34, %v728_v37 }
 0x144   :  { %v738_v26 = vpop.permute.xlu1 %737 }
 0x145   :  { %v735_v28 = vadd.f32 %v733_v15, %v708_v14  ;;  %v736_v39 = vadd.f32 %v734_v27, %v709_v35 }
 0x148   :  { %v740_v11 = vpop.permute.xlu1 %739 }
 0x149   :  { %v742_v57 = vsel %vm741_vm3, %v738_v26, %v740_v11  ;;  %v743_v32 = vsel %vm741_vm3, %v740_v11, %v738_v26 }
 0x14a   :  { %v758_v62 = vsel %vm1957_vm6, %v742_v57, 0.0  ;;  %v759_v33 = vsel %vm1961_vm9, %v743_v32, 0.0 }
 0x14b   :  { %v764_v36 = vmul.f32 %v762_v42, %v758_v62  ;;  %v765_v63 = vmul.f32 %v762_v42, %v759_v33 }
 0x14c   :  { %v771_v34 = vpop.permute.xlu1 %770 }
 0x14d   :  { %v773_v10 = vsel %vm772_vm1, %v769_v16, %v771_v34  ;;  %v774_v38 = vsel %vm772_vm1, %v771_v34, %v769_v16  ;;  %v766_v45 = vadd.f32 %v764_v36, %v735_v28  ;;  %v767_v58 = vadd.f32 %v765_v63, %v736_v39 }
 0x14e   :  { %v789_v1 = vsel %vm787_vm10, %v773_v10, 0.0  ;;  %v790_v30 = vsel %vm788_vm2, %v774_v38, 0.0 }
 0x14f   :  { %v795_v49 = vmul.f32 %v793_v5, %v789_v1  ;;  %v796_v51 = vmul.f32 %v793_v5, %v790_v30 }
 0x150   :  { %v810_v59 = vpop.permute.xlu1 %809 }
 0x151   :  { %v797_v55 = vadd.f32 %v795_v49, %v766_v45  ;;  %v798_v42 = vadd.f32 %v796_v51, %v767_v58 }
 0x153   :  { %v803_v29 = vadd.f32 %v801_v24, %v797_v55  ;;  %v804_v6 = vadd.f32 %v801_v24, %v798_v42 }
 0x155   :  { %v805_v53 = vmax.f32 %v803_v29, 0.0  ;;  %v806_v56 = vmax.f32 %v804_v6, 0.0  ;;  %v826_v52 = vpop.permute.xlu1 %825 }
 0x157   :  { %v831_v20 = vrot.slane %v805_v53, %v1544_v41  ;;  %v835_v8 = vrot.slane %v806_v56, %v1544_v41  ;;  %v895_v21 = vrot.slane %v805_v53, %v894_v2  ;;  %v899_v22 = vrot.slane %v806_v56, %v894_v2 }
 0x158   :  { %v815_v9 = vrot.slane %v805_v53, %v1332_v47  ;;  %v819_v48 = vrot.slane %v806_v56, %v1332_v47  ;;  %v847_v31 = vrot.slane %v805_v53, %v846_v13  ;;  %v851_v40 = vrot.slane %v806_v56, %v846_v13 }
 0x159   :  { %v836_v26 = vmul.f32 %v831_v20, %v826_v52  ;;  %v837_v0 = vmul.f32 %v835_v8, %v826_v52  ;;  %v900_v4 = vmul.f32 %v895_v21, %v826_v52  ;;  %v901_v7 = vmul.f32 %v899_v22, %v826_v52 }
 0x15a   :  { %v820_v61 = vmul.f32 %v815_v9, %v810_v59  ;;  %v821_v50 = vmul.f32 %v819_v48, %v810_v59  ;;  %v883_v43 = vrot.slane %v805_v53, %v882_v25  ;;  %v887_v37 = vrot.slane %v806_v56, %v882_v25  ;;  %v858_v47 = vpop.permute.xlu1 %857 }
 0x15b   :  { %v907_v5 = vrot.slane %v805_v53, %v906_v46  ;;  %v911_v18 = vrot.slane %v806_v56, %v906_v46  ;;  %v852_v41 = vmul.f32 %v847_v31, %v842_v23  ;;  %v853_v19 = vmul.f32 %v851_v40, %v842_v23 }
 0x15c   :  { %v838_v12 = vadd.f32 %v836_v26, %v820_v61  ;;  %v839_v17 = vadd.f32 %v837_v0, %v821_v50  ;;  %v888_v60 = vmul.f32 %v883_v43, %v810_v59  ;;  %v889_v3 = vmul.f32 %v887_v37, %v810_v59 }
 0x15d   :  { %v912_v11 = vmul.f32 %v907_v5, %v842_v23  ;;  %v913_v15 = vmul.f32 %v911_v18, %v842_v23  ;;  %v863_v27 = vrot.slane %v805_v53, %v862_v54  ;;  %v867_v57 = vrot.slane %v806_v56, %v862_v54 }
 0x15e   :  { %v902_v32 = vadd.f32 %v900_v4, %v888_v60  ;;  %v903_v62 = vadd.f32 %v901_v7, %v889_v3  ;;  %v854_v33 = vadd.f32 %v852_v41, %v838_v12  ;;  %v855_v14 = vadd.f32 %v853_v19, %v839_v17 }
 0x15f   :  { %v868_v35 = vmul.f32 %v863_v27, %v858_v47  ;;  %v869_v36 = vmul.f32 %v867_v57, %v858_v47  ;;  %v919_v63 = vrot.slane %v805_v53, %v918_v44  ;;  %v923_v16 = vrot.slane %v806_v56, %v918_v44  ;;  %v874_v39 = vpop.permute.xlu1 %873 }
 0x160   :  { %v914_v34 = vadd.f32 %v912_v11, %v902_v32  ;;  %v915_v28 = vadd.f32 %v913_v15, %v903_v62 }
 0x161   :  { %v924_v10 = vmul.f32 %v919_v63, %v858_v47  ;;  %v925_v38 = vmul.f32 %v923_v16, %v858_v47  ;;  %v870_v1 = vadd.f32 %v868_v35, %v854_v33  ;;  %v871_v30 = vadd.f32 %v869_v36, %v855_v14 }
 0x163   :  { %v876_v49 = vadd.f32 %v874_v39, %v870_v1  ;;  %v877_v51 = vadd.f32 %v874_v39, %v871_v30  ;;  %v926_v45 = vadd.f32 %v924_v10, %v914_v34  ;;  %v927_v58 = vadd.f32 %v925_v38, %v915_v28 }
 0x165   :  { %v878_v59 = vmax.f32 %v876_v49, 0.0  ;;  %v879_v24 = vmax.f32 %v877_v51, 0.0  ;;  %v928_v55 = vadd.f32 %v926_v45, %v874_v39  ;;  %v929_v42 = vadd.f32 %v927_v58, %v874_v39 }
 0x167   :  { %v930_v29 = vmax.f32 %v928_v55, 0.0  ;;  %v931_v6 = vmax.f32 %v929_v42, 0.0  ;;  %932 = vst [vmem:[#allocation7] sm:$0xff] %v878_v59  ;;  %933 = vst [vmem:[#allocation7 + $0x8] sm:$0xff] %v879_v24 }
 0x169   :  { %934 = vst [vmem:[#allocation7 + $0x10] sm:$0xff] %v930_v29  ;;  %935 = vst [vmem:[#allocation7 + $0x18] sm:$0xff] %v931_v6 }
 0x16a   :  { %1091 = shalt.err (!%p1088_p0)
}
 0x16b   :  { %947 = dma.vmem_to_hbm [thread:$0]  %s942_s15, 512, %s1998_s2, [#allocation4], %s1108_s17, %s1108_s17, %s1109_s18  }
 0x16c   :  { %1104 = dma.done.wait [#allocation4], 512  }
 0x16d   :  { %1105 = vsyncadd [#allocation4], 4294966784 }
 0x16e   :  { %951 = vsyncpa [#allocation3], 1 }
 0x16f   :  { %952 = vsyncpa [#allocation6], 1 }
 0x170   :  { %953 = vsyncpa [#allocation4], 1 }

</bundles_post_ra>
